<compile_context>
chip_gen: v7x
topology: tpu7x:2x2x1
jax: 0.10.0
libtpu: 0.0.40
codegen_flags: <defaults>
</compile_context>

<pallas_src>
import math

import jax
import jax.numpy as jnp
from jax.experimental import pallas as pl
from jax.experimental.pallas import tpu as pltpu

INV_SQRT2 = 1.0 / math.sqrt(2.0)
LN_EPS = 1e-5
_HI = jax.lax.Precision.HIGHEST


def _gelu_exact(x):
    # PyTorch nn.GELU() default (exact, erf-based).
    return 0.5 * x * (1.0 + jax.lax.erf(x * INV_SQRT2))


def _layernorm_cols(x, gamma, beta):
    # LayerNorm over the feature axis, which is axis 0 (sublanes) in the
    # sims-on-lanes layout.  gamma/beta are (F, 1) columns broadcast over lanes.
    mu = jnp.mean(x, axis=0, keepdims=True)
    xc = x - mu
    var = jnp.mean(xc * xc, axis=0, keepdims=True)
    return xc * jax.lax.rsqrt(var + LN_EPS) * gamma + beta


def prepack_params(params):
    """One-time, layout-only weight preprocessing. Keep OUT of the per-call path."""
    (w1, b1, g1, be1, w2, b2, g2, be2, w3, b3, wa, ba, wb, bb) = params
    f32 = jnp.float32
    N, M = w1.shape
    out_dim = w3.shape[1]
    k = out_dim // N

    w1t = jnp.asarray(w1, f32).T                          # (M, N)
    w2t = jnp.asarray(w2, f32).T                          # (M, M)

    # Group-contiguous column permutation of W3, then transpose:
    #   tanh(h @ w3 + b3).reshape(S, N, k)[:, n, i]  lives in column i*N + n.
    w3g = jnp.asarray(w3, f32).reshape(M, N, k).transpose(0, 2, 1).reshape(M, k * N)
    w3gt = w3g.T                                          # (k*N, M)
    b3g = jnp.asarray(b3, f32).reshape(N, k).T.reshape(k * N)

    eye = jnp.eye(N, dtype=f32)
    # Fused net2 first Linear over the stacked (xs0, xs1-groups) features:
    #   A[c*N+n, h*N+n'] = wa[c, h] * delta(n, n')   ->   t = z @ A
    at = jnp.kron(jnp.asarray(wa, f32), eye).T            # (H*N, (1+k)*N)
    bat = jnp.repeat(jnp.asarray(ba, f32), N)             # (H*N,)
    # net2 second Linear (4 -> 1) as a block-structured matmul, transposed.
    bt = jnp.kron(jnp.asarray(wb, f32)[:, None], eye).T   # (N, H*N)
    bbc = jnp.full((N,), jnp.asarray(bb, f32)[0], f32)    # (N,)  bb broadcast

    # Single bias slab: [b1 g1 be1 b2 g2 be2 | b3g | bat | bb*ones(N)] as a column.
    bias_slab = jnp.concatenate(
        [jnp.asarray(v, f32) for v in (b1, g1, be1, b2, g2, be2)] + [b3g, bat, bbc]
    )[:, None]                                            # (6M + kN + 4N + N, 1)

    return (w1t, w2t, w3gt, at, bt, bias_slab)


def _choose_tile_s(S, cap=4096):
    # Lane-axis tile over sims.  Multiples of 128 keep stores unmasked; for
    # S >= 256 keep >= 2 grid steps so v7x's two TensorCores can both be fed,
    # while large tiles amortize the ~0.35 us per-grid-step overhead.
    if S < 256:
        return S
    tile = ((pl.cdiv(S, 2) + 127) // 128) * 128
    return min(cap, tile)


def policy_mlp_forward(xs0, packed):
    w1t, w2t, w3gt, at, bt, bias_slab = packed
    S, N = xs0.shape
    M = w1t.shape[0]
    KN = w3gt.shape[0]          # k * N
    HN = at.shape[0]            # 4 * N
    CN = at.shape[1]            # (1 + k) * N
    BL = bias_slab.shape[0]

    # Static offsets into the bias slab (all multiples of 8 sublanes).
    o_b1, o_g1, o_be1 = 0, M, 2 * M
    o_b2, o_g2, o_be2 = 3 * M, 4 * M, 5 * M
    o_b3 = 6 * M
    o_ba = o_b3 + KN
    o_bb = o_ba + HN

    def kernel(xT_ref, w1t_ref, w2t_ref, w3gt_ref, at_ref, bt_ref, bias_ref,
               outT_ref):
        x = xT_ref[...]                                    # (N, TS) sims on lanes

        b1 = bias_ref[o_b1:o_b1 + M, :]
        g1 = bias_ref[o_g1:o_g1 + M, :]
        be1 = bias_ref[o_be1:o_be1 + M, :]
        b2 = bias_ref[o_b2:o_b2 + M, :]
        g2 = bias_ref[o_g2:o_g2 + M, :]
        be2 = bias_ref[o_be2:o_be2 + M, :]
        b3g = bias_ref[o_b3:o_b3 + KN, :]
        bat = bias_ref[o_ba:o_ba + HN, :]
        bbc = bias_ref[o_bb:o_bb + N, :]

        # ---- net1: Linear -> GELU -> LayerNorm (x2); features on sublanes ----
        h = jnp.dot(w1t_ref[...], x, precision=_HI,
                    preferred_element_type=jnp.float32) + b1
        h = _layernorm_cols(_gelu_exact(h), g1, be1)
        h = jnp.dot(w2t_ref[...], h, precision=_HI,
                    preferred_element_type=jnp.float32) + b2
        h = _layernorm_cols(_gelu_exact(h), g2, be2)       # (M, TS)

        # ---- net1 last Linear + Tanh, all k groups in one matmul ----
        xs1 = jnp.tanh(jnp.dot(w3gt_ref[...], h, precision=_HI,
                               preferred_element_type=jnp.float32) + b3g)  # (KN, TS)

        # ---- net2: concat + Linear fused into one K=(1+k)*N matmul ----
        z = jnp.concatenate([x, xs1], axis=0)              # ((1+k)*N, TS)
        t = jnp.tanh(jnp.dot(at_ref[...], z, precision=_HI,
                             preferred_element_type=jnp.float32) + bat)    # (HN, TS)
        pre = jnp.dot(bt_ref[...], t, precision=_HI,
                      preferred_element_type=jnp.float32) + bbc            # (N, TS)
        # NOTE: in a ragged tail block the padded lanes hold uninitialized
        # VMEM; every op here mixes only sublanes within a lane-column, so
        # valid sims are never contaminated and the padded lanes are clipped
        # on the output store.
        outT_ref[...] = jax.nn.sigmoid(pre)

    tile_s = _choose_tile_s(S)
    grid = (pl.cdiv(S, tile_s),)

    def resident(shape):
        # Constant index map: block stays VMEM-resident, one startup DMA.
        return pl.BlockSpec(shape, lambda i: (0, 0))

    outT = pl.pallas_call(
        kernel,
        out_shape=jax.ShapeDtypeStruct((N, S), jnp.float32),
        grid=grid,
        in_specs=[
            pl.BlockSpec((N, tile_s), lambda i: (0, i)),   # xs0^T (streamed)
            resident((M, N)),                              # w1^T
            resident((M, M)),                              # w2^T
            resident((KN, M)),                             # w3g^T (group-contig)
            resident((HN, CN)),                            # fused net2 A^T
            resident((N, HN)),                             # net2 B^T
            resident((BL, 1)),                             # all biases, one slab
        ],
        out_specs=pl.BlockSpec((N, tile_s), lambda i: (0, i)),
        compiler_params=pltpu.CompilerParams(
            dimension_semantics=("parallel",),
        ),
    )(xs0.T, w1t, w2t, w3gt, at, bt, bias_slab)

    return outT.T                                          # (S, N)


def ref_forward(xs0, params):
    (w1, b1, g1, be1, w2, b2, g2, be2, w3, b3, wa, ba, wb, bb) = params
    S, N = xs0.shape

    def ln(x, gamma, beta):
        mu = jnp.mean(x, axis=-1, keepdims=True)
        xc = x - mu
        var = jnp.mean(xc * xc, axis=-1, keepdims=True)
        return xc * jax.lax.rsqrt(var + LN_EPS) * gamma + beta

    h = ln(_gelu_exact(jnp.dot(xs0, w1, precision=_HI) + b1), g1, be1)
    h = ln(_gelu_exact(jnp.dot(h, w2, precision=_HI) + b2), g2, be2)
    xs1 = jnp.tanh(jnp.dot(h, w3, precision=_HI) + b3).reshape(S, N, -1)
    xs2 = jnp.concatenate([xs0[:, :, None], xs1], axis=2)
    t = jnp.tanh(jnp.einsum("snc,ch->snh", xs2, wa, precision=_HI) + ba)
    return jax.nn.sigmoid(jnp.einsum("snh,h->sn", t, wb, precision=_HI) + bb[0])


def init_params(key, inp_dim, mid_dim, out_dim):
    k = out_dim // inp_dim
    keys = jax.random.split(key, 10)

    def lin(kw, kb, fan_in, fan_out):
        bound = 1.0 / math.sqrt(fan_in)
        w = jax.random.uniform(kw, (fan_in, fan_out), jnp.float32, -bound, bound)
        b = jax.random.uniform(kb, (fan_out,), jnp.float32, -bound, bound)
        return w, b

    w1, b1 = lin(keys[0], keys[1], inp_dim, mid_dim)
    g1 = jnp.ones((mid_dim,), jnp.float32)
    be1 = jnp.zeros((mid_dim,), jnp.float32)
    w2, b2 = lin(keys[2], keys[3], mid_dim, mid_dim)
    g2 = jnp.ones((mid_dim,), jnp.float32)
    be2 = jnp.zeros((mid_dim,), jnp.float32)
    w3, b3 = lin(keys[4], keys[5], mid_dim, out_dim)
    wa, ba = lin(keys[6], keys[7], 1 + k, 4)
    wb2, bb2 = lin(keys[8], keys[9], 4, 1)
    wb = wb2[:, 0]                      # (4,)
    bb = bb2                            # (1,)
    return (w1, b1, g1, be1, w2, b2, g2, be2, w3, b3, wa, ba, wb, bb)


if __name__ == "__main__":
    # Small shapes consistent with the module:
    #   num_sims=8, num_nodes=inp_dim=16, mid_dim=32, out_dim=64 (k=4)
    num_sims, num_nodes = 8, 16
    inp_dim, mid_dim, out_dim = num_nodes, 32, 64

    key = jax.random.PRNGKey(0)
    kx, kp = jax.random.split(key)
    xs0 = jax.random.normal(kx, (num_sims, num_nodes), jnp.float32)
    params = init_params(kp, inp_dim, mid_dim, out_dim)

    # One-time prepack (layout-only) — outside the per-call path.
    packed = prepack_params(params)

    fwd = jax.jit(policy_mlp_forward)
    out = jax.block_until_ready(fwd(xs0, packed))
    ref = jax.block_until_ready(ref_forward(xs0, params))

    assert out.shape == (num_sims, num_nodes)
    # Tolerance leaves margin for MXU f32 pass decomposition vs XLA f32 emulation.
    assert jnp.allclose(out, ref, atol=1e-4, rtol=1e-4), "mismatch vs reference"

    print("KERNEL_OK")
</pallas_src>

<mosaic_0001>
module attributes {stable_mosaic.version = 11 : i64} {
  func.func @kernel(%arg0: i32, %arg1: memref<16x8xf32, #tpu.memory_space<vmem>>, %arg2: memref<32x16xf32, #tpu.memory_space<vmem>>, %arg3: memref<32x32xf32, #tpu.memory_space<vmem>>, %arg4: memref<64x32xf32, #tpu.memory_space<vmem>>, %arg5: memref<64x80xf32, #tpu.memory_space<vmem>>, %arg6: memref<16x64xf32, #tpu.memory_space<vmem>>, %arg7: memref<336x1xf32, #tpu.memory_space<vmem>>, %arg8: memref<16x8xf32, #tpu.memory_space<vmem>>) attributes {dimension_semantics = [#tpu.dimension_semantics<parallel>], iteration_bounds = array<i64: 1>, scalar_prefetch = 0 : i64, scratch_operands = 0 : i64, tpu.core_type = #tpu.core_type<tc>, window_params = [{transform_indices = @transform_0, window_bounds = array<i64: 16, 8>}, {pipeline_mode = #tpu.pipeline_mode<synchronous>, transform_indices = @transform_1, window_bounds = array<i64: 32, 16>}, {pipeline_mode = #tpu.pipeline_mode<synchronous>, transform_indices = @transform_2, window_bounds = array<i64: 32, 32>}, {pipeline_mode = #tpu.pipeline_mode<synchronous>, transform_indices = @transform_3, window_bounds = array<i64: 64, 32>}, {pipeline_mode = #tpu.pipeline_mode<synchronous>, transform_indices = @transform_4, window_bounds = array<i64: 64, 80>}, {pipeline_mode = #tpu.pipeline_mode<synchronous>, transform_indices = @transform_5, window_bounds = array<i64: 16, 64>}, {pipeline_mode = #tpu.pipeline_mode<synchronous>, transform_indices = @transform_6, window_bounds = array<i64: 336, 1>}, {transform_indices = @transform_7, window_bounds = array<i64: 16, 8>}]} {
    %c0 = arith.constant 0 : index
    %c0_0 = arith.constant 0 : index
    %0 = vector.load %arg1[%c0, %c0_0] : memref<16x8xf32, #tpu.memory_space<vmem>>, vector<16x8xf32>
    %c0_1 = arith.constant 0 : index
    %c0_2 = arith.constant 0 : index
    %1 = vector.load %arg7[%c0_1, %c0_2] : memref<336x1xf32, #tpu.memory_space<vmem>>, vector<32x1xf32>
    %c32 = arith.constant 32 : index
    %c0_3 = arith.constant 0 : index
    %2 = vector.load %arg7[%c32, %c0_3] : memref<336x1xf32, #tpu.memory_space<vmem>>, vector<32x1xf32>
    %c64 = arith.constant 64 : index
    %c0_4 = arith.constant 0 : index
    %3 = vector.load %arg7[%c64, %c0_4] : memref<336x1xf32, #tpu.memory_space<vmem>>, vector<32x1xf32>
    %c96 = arith.constant 96 : index
    %c0_5 = arith.constant 0 : index
    %4 = vector.load %arg7[%c96, %c0_5] : memref<336x1xf32, #tpu.memory_space<vmem>>, vector<32x1xf32>
    %c128 = arith.constant 128 : index
    %c0_6 = arith.constant 0 : index
    %5 = vector.load %arg7[%c128, %c0_6] : memref<336x1xf32, #tpu.memory_space<vmem>>, vector<32x1xf32>
    %c160 = arith.constant 160 : index
    %c0_7 = arith.constant 0 : index
    %6 = vector.load %arg7[%c160, %c0_7] : memref<336x1xf32, #tpu.memory_space<vmem>>, vector<32x1xf32>
    %c192 = arith.constant 192 : index
    %c0_8 = arith.constant 0 : index
    %7 = vector.load %arg7[%c192, %c0_8] : memref<336x1xf32, #tpu.memory_space<vmem>>, vector<64x1xf32>
    %c256 = arith.constant 256 : index
    %c0_9 = arith.constant 0 : index
    %8 = vector.load %arg7[%c256, %c0_9] : memref<336x1xf32, #tpu.memory_space<vmem>>, vector<64x1xf32>
    %c320 = arith.constant 320 : index
    %c0_10 = arith.constant 0 : index
    %9 = vector.load %arg7[%c320, %c0_10] : memref<336x1xf32, #tpu.memory_space<vmem>>, vector<16x1xf32>
    %c0_11 = arith.constant 0 : index
    %c0_12 = arith.constant 0 : index
    %10 = vector.load %arg2[%c0_11, %c0_12] : memref<32x16xf32, #tpu.memory_space<vmem>>, vector<32x16xf32>
    %cst = arith.constant dense<0.000000e+00> : vector<32x8xf32>
    %11 = tpu.matmul %10, %0, %cst {dimension_numbers = #tpu.dot_dimension_numbers<[1], [0], [0], [1], [0, 0, 1, 1], [], []>, precision = #tpu.contract_precision<fp32>} : vector<32x16xf32>, vector<16x8xf32>, vector<32x8xf32> -> vector<32x8xf32>
    %12 = vector.broadcast %1 : vector<32x1xf32> to vector<32x8xf32>
    %13 = arith.addf %11, %12 : vector<32x8xf32>
    %cst_13 = arith.constant 5.000000e-01 : f32
    %14 = vector.broadcast %cst_13 : f32 to vector<32x8xf32>
    %15 = arith.mulf %14, %13 : vector<32x8xf32>
    %cst_14 = arith.constant 0.707106769 : f32
    %16 = vector.broadcast %cst_14 : f32 to vector<32x8xf32>
    %17 = arith.mulf %13, %16 : vector<32x8xf32>
    %18 = math.erf %17 : vector<32x8xf32>
    %cst_15 = arith.constant 1.000000e+00 : f32
    %19 = vector.broadcast %cst_15 : f32 to vector<32x8xf32>
    %20 = arith.addf %19, %18 : vector<32x8xf32>
    %21 = arith.mulf %15, %20 : vector<32x8xf32>
    %cst_16 = arith.constant dense<0.000000e+00> : vector<8xf32>
    %22 = vector.multi_reduction <add>, %21, %cst_16 [0] : vector<32x8xf32> to vector<8xf32>
    %23 = vector.shape_cast %22 : vector<8xf32> to vector<1x8xf32>
    %cst_17 = arith.constant 3.200000e+01 : f32
    %24 = vector.broadcast %cst_17 : f32 to vector<1x8xf32>
    %25 = arith.divf %23, %24 : vector<1x8xf32>
    %26 = vector.broadcast %25 : vector<1x8xf32> to vector<32x8xf32>
    %27 = arith.subf %21, %26 : vector<32x8xf32>
    %28 = arith.mulf %27, %27 : vector<32x8xf32>
    %cst_18 = arith.constant dense<0.000000e+00> : vector<8xf32>
    %29 = vector.multi_reduction <add>, %28, %cst_18 [0] : vector<32x8xf32> to vector<8xf32>
    %30 = vector.shape_cast %29 : vector<8xf32> to vector<1x8xf32>
    %cst_19 = arith.constant 3.200000e+01 : f32
    %31 = vector.broadcast %cst_19 : f32 to vector<1x8xf32>
    %32 = arith.divf %30, %31 : vector<1x8xf32>
    %cst_20 = arith.constant 9.99999974E-6 : f32
    %33 = vector.broadcast %cst_20 : f32 to vector<1x8xf32>
    %34 = arith.addf %32, %33 : vector<1x8xf32>
    %35 = math.rsqrt %34 : vector<1x8xf32>
    %36 = vector.broadcast %35 : vector<1x8xf32> to vector<32x8xf32>
    %37 = arith.mulf %27, %36 : vector<32x8xf32>
    %38 = vector.broadcast %2 : vector<32x1xf32> to vector<32x8xf32>
    %39 = arith.mulf %37, %38 : vector<32x8xf32>
    %40 = vector.broadcast %3 : vector<32x1xf32> to vector<32x8xf32>
    %41 = arith.addf %39, %40 : vector<32x8xf32>
    %c0_21 = arith.constant 0 : index
    %c0_22 = arith.constant 0 : index
    %42 = vector.load %arg3[%c0_21, %c0_22] : memref<32x32xf32, #tpu.memory_space<vmem>>, vector<32x32xf32>
    %cst_23 = arith.constant dense<0.000000e+00> : vector<32x8xf32>
    %43 = tpu.matmul %42, %41, %cst_23 {dimension_numbers = #tpu.dot_dimension_numbers<[1], [0], [0], [1], [0, 0, 1, 1], [], []>, precision = #tpu.contract_precision<fp32>} : vector<32x32xf32>, vector<32x8xf32>, vector<32x8xf32> -> vector<32x8xf32>
    %44 = vector.broadcast %4 : vector<32x1xf32> to vector<32x8xf32>
    %45 = arith.addf %43, %44 : vector<32x8xf32>
    %cst_24 = arith.constant 5.000000e-01 : f32
    %46 = vector.broadcast %cst_24 : f32 to vector<32x8xf32>
    %47 = arith.mulf %46, %45 : vector<32x8xf32>
    %cst_25 = arith.constant 0.707106769 : f32
    %48 = vector.broadcast %cst_25 : f32 to vector<32x8xf32>
    %49 = arith.mulf %45, %48 : vector<32x8xf32>
    %50 = math.erf %49 : vector<32x8xf32>
    %cst_26 = arith.constant 1.000000e+00 : f32
    %51 = vector.broadcast %cst_26 : f32 to vector<32x8xf32>
    %52 = arith.addf %51, %50 : vector<32x8xf32>
    %53 = arith.mulf %47, %52 : vector<32x8xf32>
    %cst_27 = arith.constant dense<0.000000e+00> : vector<8xf32>
    %54 = vector.multi_reduction <add>, %53, %cst_27 [0] : vector<32x8xf32> to vector<8xf32>
    %55 = vector.shape_cast %54 : vector<8xf32> to vector<1x8xf32>
    %cst_28 = arith.constant 3.200000e+01 : f32
    %56 = vector.broadcast %cst_28 : f32 to vector<1x8xf32>
    %57 = arith.divf %55, %56 : vector<1x8xf32>
    %58 = vector.broadcast %57 : vector<1x8xf32> to vector<32x8xf32>
    %59 = arith.subf %53, %58 : vector<32x8xf32>
    %60 = arith.mulf %59, %59 : vector<32x8xf32>
    %cst_29 = arith.constant dense<0.000000e+00> : vector<8xf32>
    %61 = vector.multi_reduction <add>, %60, %cst_29 [0] : vector<32x8xf32> to vector<8xf32>
    %62 = vector.shape_cast %61 : vector<8xf32> to vector<1x8xf32>
    %cst_30 = arith.constant 3.200000e+01 : f32
    %63 = vector.broadcast %cst_30 : f32 to vector<1x8xf32>
    %64 = arith.divf %62, %63 : vector<1x8xf32>
    %cst_31 = arith.constant 9.99999974E-6 : f32
    %65 = vector.broadcast %cst_31 : f32 to vector<1x8xf32>
    %66 = arith.addf %64, %65 : vector<1x8xf32>
    %67 = math.rsqrt %66 : vector<1x8xf32>
    %68 = vector.broadcast %67 : vector<1x8xf32> to vector<32x8xf32>
    %69 = arith.mulf %59, %68 : vector<32x8xf32>
    %70 = vector.broadcast %5 : vector<32x1xf32> to vector<32x8xf32>
    %71 = arith.mulf %69, %70 : vector<32x8xf32>
    %72 = vector.broadcast %6 : vector<32x1xf32> to vector<32x8xf32>
    %73 = arith.addf %71, %72 : vector<32x8xf32>
    %c0_32 = arith.constant 0 : index
    %c0_33 = arith.constant 0 : index
    %74 = vector.load %arg4[%c0_32, %c0_33] : memref<64x32xf32, #tpu.memory_space<vmem>>, vector<64x32xf32>
    %cst_34 = arith.constant dense<0.000000e+00> : vector<64x8xf32>
    %75 = tpu.matmul %74, %73, %cst_34 {dimension_numbers = #tpu.dot_dimension_numbers<[1], [0], [0], [1], [0, 0, 1, 1], [], []>, precision = #tpu.contract_precision<fp32>} : vector<64x32xf32>, vector<32x8xf32>, vector<64x8xf32> -> vector<64x8xf32>
    %76 = vector.broadcast %7 : vector<64x1xf32> to vector<64x8xf32>
    %77 = arith.addf %75, %76 : vector<64x8xf32>
    %78 = math.tanh %77 : vector<64x8xf32>
    %79 = tpu.concatenate %0, %78 in 0 : vector<16x8xf32>, vector<64x8xf32> -> vector<80x8xf32>
    %c0_35 = arith.constant 0 : index
    %c0_36 = arith.constant 0 : index
    %80 = vector.load %arg5[%c0_35, %c0_36] : memref<64x80xf32, #tpu.memory_space<vmem>>, vector<64x80xf32>
    %cst_37 = arith.constant dense<0.000000e+00> : vector<64x8xf32>
    %81 = tpu.matmul %80, %79, %cst_37 {dimension_numbers = #tpu.dot_dimension_numbers<[1], [0], [0], [1], [0, 0, 1, 1], [], []>, precision = #tpu.contract_precision<fp32>} : vector<64x80xf32>, vector<80x8xf32>, vector<64x8xf32> -> vector<64x8xf32>
    %82 = vector.broadcast %8 : vector<64x1xf32> to vector<64x8xf32>
    %83 = arith.addf %81, %82 : vector<64x8xf32>
    %84 = math.tanh %83 : vector<64x8xf32>
    %c0_38 = arith.constant 0 : index
    %c0_39 = arith.constant 0 : index
    %85 = vector.load %arg6[%c0_38, %c0_39] : memref<16x64xf32, #tpu.memory_space<vmem>>, vector<16x64xf32>
    %cst_40 = arith.constant dense<0.000000e+00> : vector<16x8xf32>
    %86 = tpu.matmul %85, %84, %cst_40 {dimension_numbers = #tpu.dot_dimension_numbers<[1], [0], [0], [1], [0, 0, 1, 1], [], []>, precision = #tpu.contract_precision<fp32>} : vector<16x64xf32>, vector<64x8xf32>, vector<16x8xf32> -> vector<16x8xf32>
    %87 = vector.broadcast %9 : vector<16x1xf32> to vector<16x8xf32>
    %88 = arith.addf %86, %87 : vector<16x8xf32>
    %89 = arith.negf %88 : vector<16x8xf32>
    %90 = math.exp %89 : vector<16x8xf32>
    %cst_41 = arith.constant 1.000000e+00 : f32
    %91 = vector.broadcast %cst_41 : f32 to vector<16x8xf32>
    %92 = arith.addf %91, %90 : vector<16x8xf32>
    %93 = arith.divf %91, %92 : vector<16x8xf32>
    %c0_42 = arith.constant 0 : index
    %c0_43 = arith.constant 0 : index
    %94 = vector.load %arg8[%c0_42, %c0_43] : memref<16x8xf32, #tpu.memory_space<vmem>>, vector<16x8xf32>
    tpu.vector_store %arg8[%c0_42, %c0_43], %93 {strides = array<i32>} : memref<16x8xf32, #tpu.memory_space<vmem>>, vector<16x8xf32>,
    return
  }
  func.func @transform_0(%arg0: i32) -> (i32, i32) {
    %c0_i32 = arith.constant 0 : i32
    %c0_i32_0 = arith.constant 0 : i32
    return %c0_i32, %arg0 : i32, i32
  }
  func.func @transform_1(%arg0: i32) -> (i32, i32) {
    %c0_i32 = arith.constant 0 : i32
    %c0_i32_0 = arith.constant 0 : i32
    %c0_i32_1 = arith.constant 0 : i32
    return %c0_i32, %c0_i32_0 : i32, i32
  }
  func.func @transform_2(%arg0: i32) -> (i32, i32) {
    %c0_i32 = arith.constant 0 : i32
    %c0_i32_0 = arith.constant 0 : i32
    %c0_i32_1 = arith.constant 0 : i32
    return %c0_i32, %c0_i32_0 : i32, i32
  }
  func.func @transform_3(%arg0: i32) -> (i32, i32) {
    %c0_i32 = arith.constant 0 : i32
    %c0_i32_0 = arith.constant 0 : i32
    %c0_i32_1 = arith.constant 0 : i32
    return %c0_i32, %c0_i32_0 : i32, i32
  }
  func.func @transform_4(%arg0: i32) -> (i32, i32) {
    %c0_i32 = arith.constant 0 : i32
    %c0_i32_0 = arith.constant 0 : i32
    %c0_i32_1 = arith.constant 0 : i32
    return %c0_i32, %c0_i32_0 : i32, i32
  }
  func.func @transform_5(%arg0: i32) -> (i32, i32) {
    %c0_i32 = arith.constant 0 : i32
    %c0_i32_0 = arith.constant 0 : i32
    %c0_i32_1 = arith.constant 0 : i32
    return %c0_i32, %c0_i32_0 : i32, i32
  }
  func.func @transform_6(%arg0: i32) -> (i32, i32) {
    %c0_i32 = arith.constant 0 : i32
    %c0_i32_0 = arith.constant 0 : i32
    %c0_i32_1 = arith.constant 0 : i32
    return %c0_i32, %c0_i32_0 : i32, i32
  }
  func.func @transform_7(%arg0: i32) -> (i32, i32) {
    %c0_i32 = arith.constant 0 : i32
    %c0_i32_0 = arith.constant 0 : i32
    return %c0_i32, %arg0 : i32, i32
  }
}

</mosaic_0001>

<bundles_post_ra>
// kernel: policy_mlp_forward.1
= control target key start
LH: loop header
LB: loop body
LE: loop exit
PB: predicated region body
PF: predicated region fallthrough
CT: control target
= control target key end

     0   :  { %vm94_vm0 = vcmask 130048   ;;  %v5447_v3 = vmov 0   ;;  %vm831_vm1 = vcmask 261120   ;;  %vm715_vm2 = vcmask 64512   ;;  %s6332_s0 = inlined_call_operand.vmem [shape: f32[16,8], index: 0, kind: input, shape index: {}]   ;;  %s6333_s1 = inlined_call_operand.vmem [shape: f32[32,16], index: 1, kind: input, shape index: {}]   ;;  %s6334_s6 = inlined_call_operand.vmem [shape: f32[336,1], index: 6, kind: input, shape index: {}]   ;;  %s6335_s2 = inlined_call_operand.vmem [shape: f32[32,32], index: 2, kind: input, shape index: {}]   ;;  %s6336_s3 = inlined_call_operand.vmem [shape: f32[64,32], index: 3, kind: input, shape index: {}]   ;;  %s6337_s4 = inlined_call_operand.vmem [shape: f32[64,80], index: 4, kind: input, shape index: {}]   ;;  %s6338_s5 = inlined_call_operand.vmem [shape: f32[16,64], index: 5, kind: input, shape index: {}]   ;;  %s6339_s7 = inlined_call_operand.vmem [shape: f32[16,8], index: 7, kind: output, shape index: {}]  }
   0x1   :  { %v26_v0 = vld [vmem:[%s6332_s0] sm:$0xff]  ;;  %v27_v1 = vld [vmem:[%s6332_s0 + $0x8] sm:$0xff]  ;;  %5385 = vset.pattern.permute.xlu0 %v5447_v3  ;;  %5386 = vset.pattern.permute.xlu1 %v5447_v3  ;;  %v72_v8 = vld [vmem:[%s6333_s1 + $0x10] sm:$0xff]  ;;  %vm2482_vm3 = vcmask 654336   ;;  %vm3391_vm4 = vcmask 523264  }
   0x2   :  { %v70_v2 = vld [vmem:[%s6333_s1] sm:$0xff]  ;;  %v108_v4 = vand.u32 4294901760, %v26_v0  ;;  %v111_v5 = vand.u32 4294901760, %v27_v1  ;;  %v71_v7 = vld [vmem:[%s6333_s1 + $0x8] sm:$0xff]  ;;  %v73_v9 = vld [vmem:[%s6333_s1 + $0x18] sm:$0xff]  ;;  %v102_v12 = vsel %vm94_vm0, %v72_v8, 0 }
   0x3   :  { %v96_v6 = vsel %vm94_vm0, %v70_v2, 0  ;;  %v99_v11 = vsel %vm94_vm0, %v71_v7, 0  ;;  %v105_v13 = vsel %vm94_vm0, %v73_v9, 0  ;;  %v28_v14 = vld [vmem:[%s6334_s6] sm:$0xff]  ;;  %v30_v15 = vld [vmem:[%s6334_s6 + $0x10] sm:$0xff]  ;;  %v5529_v21 = vand.u32 4294901760, %v102_v12 }
   0x4   :  { %v5507_v10 = vand.u32 4294901760, %v96_v6  ;;  %v5518_v16 = vpack.c.bf16 %v111_v5, %v108_v4  ;;  %v5520_v17 = vand.u32 4294901760, %v99_v11  ;;  %v5522_v18 = vsub.f32 %v26_v0, %v108_v4  ;;  %76 = vperm.xlu0 %5385, %v28_v14   ;;  %86 = vperm.xlu1 %5386, %v30_v15   ;;  %v29_v23 = vld [vmem:[%s6334_s6 + $0x8] sm:$0xff]  ;;  %v31_v24 = vld [vmem:[%s6334_s6 + $0x18] sm:$0xff]  ;;  %v32_v37 = vld [vmem:[%s6334_s6 + $0x20] sm:$0xff] }
   0x5   :  { %v5524_v19 = vsub.f32 %v27_v1, %v111_v5  ;;  %v5531_v22 = vand.u32 4294901760, %v105_v13  ;;  %v5548_v29 = vsub.f32 %v102_v12, %v5529_v21  ;;  %v33_v38 = vld [vmem:[%s6334_s6 + $0x28] sm:$0xff]  ;;  %v36_v49 = vld [vmem:[%s6334_s6 + $0x40] sm:$0xff]  ;;  %v34_v52 = vld [vmem:[%s6334_s6 + $0x30] sm:$0xff] }
   0x6   :  { %v5527_v20 = vsub.f32 %v96_v6, %v5507_v10  ;;  %4893 = vmatprep.subr.bf16.mxu0 %v5518_v16  ;;  %v5541_v25 = vsub.f32 %v99_v11, %v5520_v17  ;;  %v217_v26 = vand.u32 4294901760, %v5522_v18  ;;  %v37_v51 = vld [vmem:[%s6334_s6 + $0x48] sm:$0xff]  ;;  %v35_v53 = vld [vmem:[%s6334_s6 + $0x38] sm:$0xff]  ;;  %v38_v54 = vld [vmem:[%s6334_s6 + $0x50] sm:$0xff] }
   0x7   :  { %v224_v27 = vand.u32 4294901760, %v5524_v19  ;;  %4895 = vmatpush3.bf16.msra.mxu0 %v5518_v16  ;;  %v5551_v30 = vsub.f32 %v105_v13, %v5531_v22  ;;  %v196_v35 = vand.u32 4294901760, %v5548_v29  ;;  %v5580_v47 = vpack.c.bf16 %v5524_v19, %v5522_v18  ;;  %v39_v55 = vld [vmem:[%s6334_s6 + $0x58] sm:$0xff]  ;;  %v40_v56 = vld [vmem:[%s6334_s6 + $0x60] sm:$0xff]  ;;  %v41_v57 = vld [vmem:[%s6334_s6 + $0x68] sm:$0xff] }
   0x8   :  { %v176_v28 = vand.u32 4294901760, %v5527_v20  ;;  %v186_v31 = vand.u32 4294901760, %v5541_v25  ;;  %v218_v32 = vsub.f32 %v5522_v18, %v217_v26  ;;  %81 = vperm.xlu0 %5385, %v29_v23   ;;  %91 = vperm.xlu1 %5386, %v31_v24   ;;  %v42_v59 = vld [vmem:[%s6334_s6 + $0x70] sm:$0xff]  ;;  %v43_v60 = vld [vmem:[%s6334_s6 + $0x78] sm:$0xff]  ;;  %v44_v61 = vld [vmem:[%s6334_s6 + $0x80] sm:$0xff] }
   0x9   :  { %v225_v33 = vsub.f32 %v5524_v19, %v224_v27  ;;  %v206_v36 = vand.u32 4294901760, %v5551_v30  ;;  %v197_v43 = vsub.f32 %v5548_v29, %v196_v35  ;;  %v5616_v58 = vpack.c.bf16 %v224_v27, %v217_v26  ;;  %v45_v62 = vld [vmem:[%s6334_s6 + $0x88] sm:$0xff]  ;;  %v48_v63 = vld [vmem:[%s6334_s6 + $0xa0] sm:$0xff]  ;;  %v46_v1 = vld [vmem:[%s6334_s6 + $0x90] sm:$0xff] }
   0xa   :  { %v177_v34 = vsub.f32 %v5527_v20, %v176_v28  ;;  %v187_v39 = vsub.f32 %v5541_v25, %v186_v31  ;;  %v219_v40 = vand.u32 4294901760, %v218_v32  ;;  %v49_v0 = vld [vmem:[%s6334_s6 + $0xa8] sm:$0xff]  ;;  %v47_v2 = vld [vmem:[%s6334_s6 + $0x98] sm:$0xff]  ;;  %v50_v3 = vld [vmem:[%s6334_s6 + $0xb0] sm:$0xff] }
   0xb   :  { %v226_v41 = vand.u32 4294901760, %v225_v33  ;;  %v207_v44 = vsub.f32 %v5551_v30, %v206_v36  ;;  %v198_v48 = vand.u32 4294901760, %v197_v43  ;;  %v51_v4 = vld [vmem:[%s6334_s6 + $0xb8] sm:$0xff]  ;;  %v52_v5 = vld [vmem:[%s6334_s6 + $0xc0] sm:$0xff]  ;;  %v53_v6 = vld [vmem:[%s6334_s6 + $0xc8] sm:$0xff] }
   0xc   :  { %v178_v42 = vand.u32 4294901760, %v177_v34  ;;  %v188_v45 = vand.u32 4294901760, %v187_v39  ;;  %761 = vperm.xlu0 %5385, %v32_v37   ;;  %766 = vperm.xlu1 %5386, %v33_v38   ;;  %v54_v7 = vld [vmem:[%s6334_s6 + $0xd0] sm:$0xff]  ;;  %v55_v8 = vld [vmem:[%s6334_s6 + $0xd8] sm:$0xff]  ;;  %v56_v9 = vld [vmem:[%s6334_s6 + $0xe0] sm:$0xff] }
   0xd   :  { %v5576_v46 = vpack.c.bf16 %v226_v41, %v219_v40  ;;  %v208_v50 = vand.u32 4294901760, %v207_v44  ;;  %v58_v11 = vld [vmem:[%s6334_s6 + $0xf0] sm:$0xff]  ;;  %v59_v12 = vld [vmem:[%s6334_s6 + $0xf8] sm:$0xff]  ;;  %v60_v13 = vld [vmem:[%s6334_s6 + $0x100] sm:$0xff] }
   0xe   :  { %4326 = vmatprep.mubr.f32.mxu0 %v178_v42  ;;  %v61_v14 = vld [vmem:[%s6334_s6 + $0x108] sm:$0xff]  ;;  %v62_v15 = vld [vmem:[%s6334_s6 + $0x110] sm:$0xff]  ;;  %v64_v18 = vld [vmem:[%s6334_s6 + $0x120] sm:$0xff] }
   0xf   :  { %4327 = vmatmul.mubr.f32.vlgmr.msra.gmra.mrb[0].mxu0 %v188_v45  ;;  %4897 = vmatprep.subr.bf16.mxu0 %v5576_v46  ;;  %v65_v19 = vld [vmem:[%s6334_s6 + $0x128] sm:$0xff]  ;;  %v807_v24 = vld [vmem:[%s6335_s2] sm:$0xff] }
  0x10   :  { %4899 = vmatpush3.bf16.msra.mxu0 %v5576_v46  ;;  %4329 = vmatprep.mubr.f32.mxu0 %v198_v48  ;;  %v69_v23 = vld [vmem:[%s6334_s6 + $0x148] sm:$0xff] }
  0x11   :  { %4901 = vmatprep.subr.bf16.mxu0 %v5580_v47  ;;  %785 = vperm.xlu0 %5385, %v36_v49  }
  0x12   :  { %790 = vperm.xlu1 %5386, %v37_v51  }
  0x13   :  { %4330 = vmatmul.mubr.f32.gmra.mrb[2].mxu0 %v208_v50 }
  0x14   :  { %4336 = vmatprep.mubr.f32.mxu0 %v5507_v10 }
  0x15   :  { %771 = vperm.xlu0 %5385, %v34_v52  }
  0x16   :  { %776 = vperm.xlu1 %5386, %v35_v53  }
  0x17   :  { %4337 = vmatmul.mubr.f32.vlgmr.msra.gmra.mrb[0].mxu0 %v5520_v17 }
  0x18   :  { %4903 = vmatpush3.bf16.msra.mxu0 %v5580_v47  ;;  %4339 = vmatprep.mubr.f32.mxu0 %v5529_v21 }
  0x19   :  { %4905 = vmatprep.subr.bf16.mxu0 %v5518_v16  ;;  %795 = vperm.xlu0 %5385, %v38_v54  }
  0x1a   :  { %800 = vperm.xlu1 %5386, %v39_v55  }
  0x1b   :  { %4340 = vmatmul.mubr.f32.gmra.mrb[2].mxu0 %v5531_v22 }
  0x1c   :  { %4346 = vmatprep.mubr.f32.mxu0 %v5527_v20  ;;  %v66_v20 = vld [vmem:[%s6334_s6 + $0x130] sm:$0xff] }
  0x1d   :  { %813 = vperm.xlu0 %5385, %v40_v56  }
  0x1e   :  { %818 = vperm.xlu1 %5386, %v41_v57  }
  0x1f   :  { %4347 = vmatmul.mubr.f32.vlgmr.msra.gmra.mrb[0].mxu0 %v5541_v25  ;;  %v833_v25 = vsel %vm831_vm1, %v807_v24, 0 }
  0x20   :  { %4907 = vmatpush3.bf16.msra.mxu0 %v5518_v16  ;;  %4349 = vmatprep.mubr.f32.mxu0 %v5548_v29  ;;  %v5730_v26 = vand.u32 4294901760, %v833_v25 }
  0x21   :  { %4909 = vmatprep.subr.bf16.mxu0 %v5616_v58  ;;  %823 = vperm.xlu0 %5385, %v42_v59  }
  0x22   :  { %828 = vperm.xlu1 %5386, %v43_v60   ;;  %v5733_v27 = vsub.f32 %v833_v25, %v5730_v26 }
  0x23   :  { %4350 = vmatmul.mubr.f32.gmra.mrb[2].mxu0 %v5551_v30 }
  0x24   :  { %4356 = vmatprep.mubr.f32.mxu0 %v176_v28  ;;  %v915_v28 = vand.u32 4294901760, %v5733_v27 }
  0x25   :  { %1522 = vperm.xlu0 %5385, %v44_v61  }
  0x26   :  { %1527 = vperm.xlu1 %5386, %v45_v62   ;;  %v916_v29 = vsub.f32 %v5733_v27, %v915_v28 }
  0x27   :  { %4357 = vmatmul.mubr.f32.vlgmr.msra.gmra.mrb[0].mxu0 %v186_v31 }
  0x28   :  { %4911 = vmatpush3.bf16.msra.mxu0 %v5616_v58  ;;  %4359 = vmatprep.mubr.f32.mxu0 %v196_v35  ;;  %v917_v30 = vand.u32 4294901760, %v916_v29 }
  0x29   :  { %4913 = vmatprep.subr.bf16.mxu0 %v5518_v16  ;;  %1546 = vperm.xlu0 %5385, %v48_v63  }
  0x2a   :  { %1551 = vperm.xlu1 %5386, %v49_v0   ;;  %4390 = vmatprep.mubr.f32.mxu1 %v917_v30 }
  0x2b   :  { %4360 = vmatmul.mubr.f32.gmra.mrb[2].mxu0 %v206_v36 }
  0x2c   :  { %4366 = vmatprep.mubr.f32.mxu0 %v5507_v10 }
  0x2d   :  { %1532 = vperm.xlu0 %5385, %v46_v1  }
  0x2e   :  { %1537 = vperm.xlu1 %5386, %v47_v2  }
  0x2f   :  { %4367 = vmatmul.mubr.f32.vlgmr.msra.gmra.mrb[0].mxu0 %v5520_v17 }
  0x30   :  { %4915 = vmatpush3.bf16.msra.mxu0 %v5518_v16  ;;  %4369 = vmatprep.mubr.f32.mxu0 %v5529_v21 }
  0x31   :  { %1556 = vperm.xlu0 %5385, %v50_v3  }
  0x32   :  { %1561 = vperm.xlu1 %5386, %v51_v4  }
  0x33   :  { %4370 = vmatmul.mubr.f32.gmra.mrb[2].mxu0 %v5531_v22 }
  0x34   :  { %4376 = vmatprep.mubr.f32.mxu0 %v5507_v10  ;;  %v57_v10 = vld [vmem:[%s6334_s6 + $0xe8] sm:$0xff] }
  0x35   :  { %1578 = vperm.xlu0 %5385, %v52_v5  }
  0x36   :  { %1583 = vperm.xlu1 %5386, %v53_v6  }
  0x37   :  { %4377 = vmatmul.mubr.f32.vlgmr.msra.gmra.mrb[0].mxu0 %v5520_v17  ;;  %v63_v17 = vld [vmem:[%s6334_s6 + $0x118] sm:$0xff] }
  0x38   :  { %4379 = vmatprep.mubr.f32.mxu0 %v5529_v21  ;;  %v67_v21 = vld [vmem:[%s6334_s6 + $0x138] sm:$0xff] }
  0x39   :  { %1588 = vperm.xlu0 %5385, %v54_v7  }
  0x3a   :  { %1593 = vperm.xlu1 %5386, %v55_v8  }
  0x3b   :  { %4380 = vmatmul.mubr.f32.gmra.mrb[2].mxu0 %v5531_v22  ;;  %v68_v22 = vld [vmem:[%s6334_s6 + $0x140] sm:$0xff] }
  0x3d   :  { %1598 = vperm.xlu0 %5385, %v56_v9  }
  0x3e   :  { %1603 = vperm.xlu1 %5386, %v57_v10  }
  0x41   :  { %1608 = vperm.xlu0 %5385, %v58_v11  }
  0x42   :  { %1613 = vperm.xlu1 %5386, %v59_v12  }
  0x45   :  { %2444 = vperm.xlu0 %5385, %v60_v13  }
  0x46   :  { %2449 = vperm.xlu1 %5386, %v61_v14  }
  0x49   :  { %2454 = vperm.xlu0 %5385, %v62_v15  }
  0x4a   :  { %2459 = vperm.xlu1 %5386, %v63_v17  }
  0x4d   :  { %2464 = vperm.xlu0 %5385, %v64_v18  }
  0x4e   :  { %2469 = vperm.xlu1 %5386, %v65_v19  }
  0x51   :  { %2474 = vperm.xlu0 %5385, %v66_v20  }
  0x52   :  { %2479 = vperm.xlu1 %5386, %v67_v21  }
  0x55   :  { %3383 = vperm.xlu0 %5385, %v68_v22  }
  0x56   :  { %3388 = vperm.xlu1 %5386, %v69_v23  }
  0x83   :  { %v77_v31 = vpop.permute.xlu0 %76  ;;  %v87_v32 = vpop.permute.xlu1 %86 }
  0x87   :  { %v82_v33 = vpop.permute.xlu0 %81  ;;  %v92_v39 = vpop.permute.xlu1 %91 }
 0x10a   :  { %v4378_v34 = vpop.f32.mrb[0].mxu0 }
 0x10b   :  { %v5228_v35 = vadd.f32 %v4378_v34, %v82_v33  ;;  %v673_v36 = vpop.f32.mrb[1].mxu0 }
 0x10c   :  { %v5229_v37 = vadd.f32 %v673_v36, %v77_v31 }
 0x10d   :  { %v700_v38 = vmul.f32 0.70710677, %v5228_v35  ;;  %v696_v51 = vmul.f32 0.5, %v5228_v35 }
 0x10e   :  { %v699_v40 = vmul.f32 0.70710677, %v5229_v37  ;;  %v4381_v41 = vpop.f32.mrb[2].mxu0  ;;  %v695_v53 = vmul.f32 0.5, %v5229_v37 }
 0x10f   :  { %5387 = verf.f32 %v700_v38  ;;  %v5230_v42 = vadd.f32 %v4381_v41, %v92_v39  ;;  %v685_v43 = vpop.f32.mrb[3].mxu0  ;;  %v762_v41 = vpop.permute.xlu0 %761 }
 0x110   :  { %5389 = verf.f32 %v699_v40  ;;  %v5231_v44 = vadd.f32 %v685_v43, %v87_v32 }
 0x111   :  { %v702_v45 = vmul.f32 0.70710677, %v5230_v42  ;;  %v698_v63 = vmul.f32 0.5, %v5230_v42  ;;  %v767_v42 = vpop.permute.xlu1 %766 }
 0x112   :  { %v701_v48 = vmul.f32 0.70710677, %v5231_v44  ;;  %v697_v0 = vmul.f32 0.5, %v5231_v44 }
 0x113   :  { %5391 = verf.f32 %v702_v45  ;;  %v786_v45 = vpop.permute.xlu0 %785 }
 0x114   :  { %5393 = verf.f32 %v701_v48 }
 0x115   :  { %v791_v48 = vpop.permute.xlu1 %790 }
 0x119   :  { %v5388_v49 = vpop.eup %5387 }
 0x11a   :  { %v5390_v50 = vpop.eup %5389  ;;  %v708_v52 = vadd.f32 1.0, %v5388_v49  ;;  %v808_v49 = vld [vmem:[%s6335_s2 + $0x8] sm:$0xff] }
 0x11b   :  { %v707_v54 = vadd.f32 1.0, %v5390_v50  ;;  %v809_v50 = vld [vmem:[%s6335_s2 + $0x10] sm:$0xff] }
 0x11c   :  { %v712_v55 = vmul.f32 %v708_v52, %v696_v51  ;;  %v836_v51 = vsel %vm831_vm1, %v808_v49, 0  ;;  %v810_v52 = vld [vmem:[%s6335_s2 + $0x18] sm:$0xff] }
 0x11d   :  { %v5392_v56 = vpop.eup %5391  ;;  %v711_v57 = vmul.f32 %v707_v54, %v695_v53  ;;  %v839_v53 = vsel %vm831_vm1, %v809_v50, 0  ;;  %v772_v54 = vpop.permute.xlu0 %771 }
 0x11e   :  { %v5394_v59 = vpop.eup %5393  ;;  %v717_v60 = vsel %vm715_vm2, %v712_v55, 0.0  ;;  %v710_v61 = vadd.f32 1.0, %v5392_v56  ;;  %v5758_v56 = vand.u32 4294901760, %v836_v51 }
 0x11f   :  { %v716_v62 = vsel %vm715_vm2, %v711_v57, 0.0  ;;  %v709_v1 = vadd.f32 1.0, %v5394_v59 }
 0x120   :  { %v718_v2 = vadd.f32 %v717_v60, %v716_v62  ;;  %v714_v3 = vmul.f32 %v710_v61, %v698_v63  ;;  %v5761_v60 = vand.u32 4294901760, %v839_v53 }
 0x121   :  { %v713_v4 = vmul.f32 %v709_v1, %v697_v0  ;;  %v5764_v1 = vsub.f32 %v836_v51, %v5758_v56 }
 0x122   :  { %v721_v7 = vsel %vm715_vm2, %v714_v3, 0.0 }
 0x123   :  { %v719_v5 = vsel %vm715_vm2, %v713_v4, 0.0 }
 0x124   :  { %v720_v6 = vadd.f32 %v719_v5, %v718_v2 }
 0x126   :  { %v722_v8 = vadd.f32 %v721_v7, %v720_v6  ;;  %v796_v7 = vpop.permute.xlu0 %795 }
 0x128   :  { %v723_v9 = vrot.slane %v722_v8, 4 }
 0x12a   :  { %v724_v10 = vadd.f32 %v723_v9, %v722_v8  ;;  %v5769_v9 = vsub.f32 %v839_v53, %v5761_v60 }
 0x12c   :  { %v725_v11 = vrot.slane %v724_v10, 2 }
 0x12e   :  { %v726_v12 = vadd.f32 %v725_v11, %v724_v10 }
 0x130   :  { %v727_v13 = vrot.slane %v726_v12, 1 }
 0x132   :  { %v728_v14 = vadd.f32 %v727_v13, %v726_v12 }
 0x134   :  { %v730_v15 = vmul.f32 0.03125, %v728_v14  ;;  %v925_v14 = vand.u32 4294901760, %v5764_v1 }
 0x136   :  { %v731_v17 = vsub.f32 %v711_v57, %v730_v15  ;;  %v732_v18 = vsub.f32 %v712_v55, %v730_v15  ;;  %v733_v19 = vsub.f32 %v713_v4, %v730_v15  ;;  %v734_v20 = vsub.f32 %v714_v3, %v730_v15  ;;  %v777_v55 = vpop.permute.xlu1 %776 }
 0x137   :  { %v842_v57 = vsel %vm831_vm1, %v810_v52, 0 }
 0x138   :  { %v735_v21 = vmul.f32 %v731_v17, %v731_v17  ;;  %v736_v22 = vmul.f32 %v732_v18, %v732_v18  ;;  %v737_v23 = vmul.f32 %v733_v19, %v733_v19  ;;  %v738_v24 = vmul.f32 %v734_v20, %v734_v20 }
 0x139   :  { %v5766_v2 = vand.u32 4294901760, %v842_v57 }
 0x13a   :  { %v739_v25 = vsel %vm715_vm2, %v735_v21, 0.0  ;;  %v740_v29 = vsel %vm715_vm2, %v736_v22, 0.0  ;;  %v742_v31 = vsel %vm715_vm2, %v737_v23, 0.0  ;;  %v744_v33 = vsel %vm715_vm2, %v738_v24, 0.0  ;;  %v801_v8 = vpop.permute.xlu1 %800 }
 0x13b   :  { %v741_v30 = vadd.f32 %v740_v29, %v739_v25  ;;  %v5773_v15 = vsub.f32 %v842_v57, %v5766_v2  ;;  %v935_v21 = vand.u32 4294901760, %v5769_v9  ;;  %v926_v29 = vsub.f32 %v5764_v1, %v925_v14 }
 0x13d   :  { %v743_v32 = vadd.f32 %v742_v31, %v741_v30 }
 0x13f   :  { %v745_v34 = vadd.f32 %v744_v33, %v743_v32 }
 0x141   :  { %v746_v35 = vrot.slane %v745_v34, 4 }
 0x143   :  { %v747_v36 = vadd.f32 %v746_v35, %v745_v34  ;;  %v945_v34 = vand.u32 4294901760, %v5773_v15 }
 0x145   :  { %v748_v37 = vrot.slane %v747_v36, 2  ;;  %v946_v51 = vsub.f32 %v5773_v15, %v945_v34 }
 0x147   :  { %v749_v38 = vadd.f32 %v748_v37, %v747_v36 }
 0x149   :  { %v750_v39 = vrot.slane %v749_v38, 1 }
 0x14b   :  { %v751_v40 = vadd.f32 %v750_v39, %v749_v38  ;;  %v936_v38 = vsub.f32 %v5769_v9, %v935_v21 }
 0x14d   :  { %v752_v43 = vmul.f32 0.03125, %v751_v40 }
 0x14f   :  { %v753_v44 = vadd.f32 1e-05, %v752_v43 }
 0x151   :  { %5395 = vrsqrt.f32 %v753_v44 }
 0x15b   :  { %v5396_v59 = vpop.eup %5395 }
 0x15c   :  { %v755_v61 = vmul.f32 %v5396_v59, %v731_v17  ;;  %v756_v62 = vmul.f32 %v5396_v59, %v732_v18  ;;  %v757_v63 = vmul.f32 %v5396_v59, %v733_v19  ;;  %v758_v0 = vmul.f32 %v5396_v59, %v734_v20 }
 0x15d   :  { %v947_v59 = vand.u32 4294901760, %v946_v51 }
 0x15e   :  { %v779_v3 = vmul.f32 %v762_v41, %v755_v61  ;;  %v780_v4 = vmul.f32 %v767_v42, %v756_v62  ;;  %v781_v5 = vmul.f32 %v772_v54, %v757_v63  ;;  %v782_v6 = vmul.f32 %v777_v55, %v758_v0  ;;  %v819_v63 = vpop.permute.xlu1 %818  ;;  %v814_v0 = vpop.permute.xlu0 %813 }
 0x15f   :  { %v937_v54 = vand.u32 4294901760, %v936_v38 }
 0x160   :  { %v805_v10 = vadd.f32 %v796_v7, %v781_v5  ;;  %v806_v11 = vadd.f32 %v801_v8, %v782_v6  ;;  %v803_v12 = vadd.f32 %v786_v45, %v779_v3  ;;  %v804_v13 = vadd.f32 %v791_v48, %v780_v4 }
 0x161   :  { %v927_v48 = vand.u32 4294901760, %v926_v29 }
 0x162   :  { %v851_v17 = vand.u32 4294901760, %v805_v10  ;;  %v854_v18 = vand.u32 4294901760, %v806_v11  ;;  %v845_v19 = vand.u32 4294901760, %v803_v12  ;;  %v848_v20 = vand.u32 4294901760, %v804_v13  ;;  %v829_v6 = vpop.permute.xlu1 %828 }
 0x164   :  { %v5776_v22 = vpack.c.bf16 %v854_v18, %v851_v17  ;;  %v5778_v23 = vpack.c.bf16 %v848_v20, %v845_v19  ;;  %v955_v24 = vsub.f32 %v803_v12, %v845_v19  ;;  %v962_v25 = vsub.f32 %v804_v13, %v848_v20 }
 0x165   :  { %v969_v30 = vsub.f32 %v805_v10, %v851_v17  ;;  %v976_v31 = vsub.f32 %v806_v11, %v854_v18 }
 0x166   :  { %4917 = vmatprep.subr.bf16.mxu1 %v5778_v23  ;;  %v956_v32 = vand.u32 4294901760, %v955_v24  ;;  %v963_v33 = vand.u32 4294901760, %v962_v25  ;;  %v4932_v35 = vpack.c.bf16 %v962_v25, %v955_v24 }
 0x167   :  { %4919 = vmatpush3.bf16.msra.mxu1 %v5778_v23  ;;  %v970_v36 = vand.u32 4294901760, %v969_v30  ;;  %v977_v37 = vand.u32 4294901760, %v976_v31  ;;  %v4936_v39 = vpack.c.bf16 %v976_v31, %v969_v30 }
 0x168   :  { %4921 = vmatprep.subr.bf16.mxu1 %v5776_v22  ;;  %v957_v40 = vsub.f32 %v955_v24, %v956_v32  ;;  %v964_v41 = vsub.f32 %v962_v25, %v963_v33  ;;  %v4948_v42 = vpack.c.bf16 %v963_v33, %v956_v32 }
 0x169   :  { %v971_v43 = vsub.f32 %v969_v30, %v970_v36  ;;  %v978_v44 = vsub.f32 %v976_v31, %v977_v37  ;;  %v4952_v45 = vpack.c.bf16 %v977_v37, %v970_v36 }
 0x16a   :  { %v958_v49 = vand.u32 4294901760, %v957_v40  ;;  %v965_v50 = vand.u32 4294901760, %v964_v41 }
 0x16b   :  { %4923 = vmatpush3.bf16.msra.mxu1 %v5776_v22  ;;  %v972_v52 = vand.u32 4294901760, %v971_v43  ;;  %v979_v53 = vand.u32 4294901760, %v978_v44 }
 0x16c   :  { %v4924_v55 = vpack.c.bf16 %v965_v50, %v958_v49 }
 0x16d   :  { %v4928_v57 = vpack.c.bf16 %v979_v53, %v972_v52 }
 0x16e   :  { %4391 = vmatmul.mubr.f32.vlgmr.msra.gmra.mrb[0].mxu1 %v927_v48  ;;  %4925 = vmatprep.subr.bf16.mxu1 %v4924_v55 }
 0x16f   :  { %4927 = vmatpush3.bf16.msra.mxu1 %v4924_v55  ;;  %4393 = vmatprep.mubr.f32.mxu1 %v937_v54 }
 0x170   :  { %4929 = vmatprep.subr.bf16.mxu1 %v4928_v57 }
 0x172   :  { %4394 = vmatmul.mubr.f32.gmra.mrb[2].mxu1 %v947_v59 }
 0x173   :  { %4931 = vmatpush3.bf16.msra.mxu1 %v4928_v57  ;;  %4404 = vmatprep.mubr.f32.mxu1 %v5730_v26 }
 0x174   :  { %4933 = vmatprep.subr.bf16.mxu1 %v4932_v35 }
 0x176   :  { %4405 = vmatmul.mubr.f32.vlgmr.msra.gmra.mrb[0].mxu1 %v5758_v56 }
 0x177   :  { %4935 = vmatpush3.bf16.msra.mxu1 %v4932_v35  ;;  %4407 = vmatprep.mubr.f32.mxu1 %v5761_v60 }
 0x178   :  { %4937 = vmatprep.subr.bf16.mxu1 %v4936_v39 }
 0x17a   :  { %4408 = vmatmul.mubr.f32.gmra.mrb[2].mxu1 %v5766_v2 }
 0x17b   :  { %4939 = vmatpush3.bf16.msra.mxu1 %v4936_v39  ;;  %4418 = vmatprep.mubr.f32.mxu1 %v5733_v27  ;;  %v1568_v27 = vld [vmem:[%s6336_s3] sm:$0xff] }
 0x17c   :  { %4941 = vmatprep.subr.bf16.mxu1 %v5778_v23 }
 0x17e   :  { %4419 = vmatmul.mubr.f32.vlgmr.msra.gmra.mrb[0].mxu1 %v5764_v1 }
 0x17f   :  { %4943 = vmatpush3.bf16.msra.mxu1 %v5778_v23  ;;  %4421 = vmatprep.mubr.f32.mxu1 %v5769_v9  ;;  %v824_v9 = vpop.permute.xlu0 %823 }
 0x180   :  { %4945 = vmatprep.subr.bf16.mxu1 %v5776_v22 }
 0x182   :  { %4422 = vmatmul.mubr.f32.gmra.mrb[2].mxu1 %v5773_v15 }
 0x183   :  { %4947 = vmatpush3.bf16.msra.mxu1 %v5776_v22  ;;  %4432 = vmatprep.mubr.f32.mxu1 %v915_v28  ;;  %v1617_v28 = vsel %vm831_vm1, %v1568_v27, 0 }
 0x184   :  { %4949 = vmatprep.subr.bf16.mxu1 %v4948_v42  ;;  %v5822_v61 = vand.u32 4294901760, %v1617_v28 }
 0x186   :  { %4433 = vmatmul.mubr.f32.vlgmr.msra.gmra.mrb[0].mxu1 %v925_v14  ;;  %v5825_v62 = vsub.f32 %v1617_v28, %v5822_v61  ;;  %4494 = vmatprep.mubr.f32.mxu0 %v5822_v61 }
 0x187   :  { %4951 = vmatpush3.bf16.msra.mxu1 %v4948_v42  ;;  %4435 = vmatprep.mubr.f32.mxu1 %v935_v21 }
 0x188   :  { %4953 = vmatprep.subr.bf16.mxu1 %v4952_v45 }
 0x18a   :  { %4436 = vmatmul.mubr.f32.gmra.mrb[2].mxu1 %v945_v34 }
 0x18b   :  { %4955 = vmatpush3.bf16.msra.mxu1 %v4952_v45  ;;  %4446 = vmatprep.mubr.f32.mxu1 %v5730_v26 }
 0x18c   :  { %4957 = vmatprep.subr.bf16.mxu1 %v5778_v23 }
 0x18e   :  { %4447 = vmatmul.mubr.f32.vlgmr.msra.gmra.mrb[0].mxu1 %v5758_v56 }
 0x18f   :  { %4959 = vmatpush3.bf16.msra.mxu1 %v5778_v23  ;;  %4449 = vmatprep.mubr.f32.mxu1 %v5761_v60 }
 0x190   :  { %4961 = vmatprep.subr.bf16.mxu1 %v5776_v22 }
 0x192   :  { %4450 = vmatmul.mubr.f32.gmra.mrb[2].mxu1 %v5766_v2 }
 0x193   :  { %4963 = vmatpush3.bf16.msra.mxu1 %v5776_v22  ;;  %4460 = vmatprep.mubr.f32.mxu1 %v5730_v26  ;;  %v1711_v26 = vand.u32 4294901760, %v5825_v62 }
 0x196   :  { %4461 = vmatmul.mubr.f32.vlgmr.msra.gmra.mrb[0].mxu1 %v5758_v56  ;;  %v1712_v56 = vsub.f32 %v5825_v62, %v1711_v26 }
 0x197   :  { %4463 = vmatprep.mubr.f32.mxu1 %v5761_v60 }
 0x198   :  { %v1713_v60 = vand.u32 4294901760, %v1712_v56 }
 0x19a   :  { %4464 = vmatmul.mubr.f32.gmra.mrb[2].mxu1 %v5766_v2 }
 0x19b   :  { %4474 = vmatprep.mubr.f32.mxu1 %v1713_v60 }
 0x269   :  { %v4462_v1 = vpop.f32.mrb[0].mxu1 }
 0x26a   :  { %v5232_v2 = vadd.f32 %v4462_v1, %v819_v63  ;;  %v1436_v3 = vpop.f32.mrb[1].mxu1 }
 0x26b   :  { %v5233_v4 = vadd.f32 %v1436_v3, %v814_v0 }
 0x26c   :  { %v1463_v5 = vmul.f32 0.70710677, %v5232_v2  ;;  %v1459_v18 = vmul.f32 0.5, %v5232_v2 }
 0x26d   :  { %v1462_v7 = vmul.f32 0.70710677, %v5233_v4  ;;  %v4465_v8 = vpop.f32.mrb[2].mxu1  ;;  %v1458_v20 = vmul.f32 0.5, %v5233_v4 }
 0x26e   :  { %5397 = verf.f32 %v1463_v5  ;;  %v5234_v10 = vadd.f32 %v4465_v8, %v829_v6  ;;  %v1448_v11 = vpop.f32.mrb[3].mxu1 }
 0x26f   :  { %5399 = verf.f32 %v1462_v7  ;;  %v5235_v12 = vadd.f32 %v1448_v11, %v824_v9  ;;  %v1569_v9 = vld [vmem:[%s6336_s3 + $0x8] sm:$0xff]  ;;  %v1528_v11 = vpop.permute.xlu1 %1527 }
 0x270   :  { %v1465_v13 = vmul.f32 0.70710677, %v5234_v10  ;;  %v1461_v32 = vmul.f32 0.5, %v5234_v10  ;;  %v1523_v10 = vpop.permute.xlu0 %1522 }
 0x271   :  { %v1464_v14 = vmul.f32 0.70710677, %v5235_v12  ;;  %v1460_v33 = vmul.f32 0.5, %v5235_v12 }
 0x272   :  { %5401 = verf.f32 %v1465_v13  ;;  %v1620_v13 = vsel %vm831_vm1, %v1569_v9, 0 }
 0x273   :  { %5403 = verf.f32 %v1464_v14 }
 0x278   :  { %v5398_v15 = vpop.eup %5397 }
 0x279   :  { %v5400_v17 = vpop.eup %5399  ;;  %v1471_v19 = vadd.f32 1.0, %v5398_v15  ;;  %v5844_v15 = vand.u32 4294901760, %v1620_v13 }
 0x27a   :  { %v1470_v21 = vadd.f32 1.0, %v5400_v17  ;;  %v1570_v17 = vld [vmem:[%s6336_s3 + $0x10] sm:$0xff] }
 0x27b   :  { %v1475_v22 = vmul.f32 %v1471_v19, %v1459_v18  ;;  %v1547_v18 = vpop.permute.xlu0 %1546  ;;  %v1552_v19 = vpop.permute.xlu1 %1551 }
 0x27c   :  { %v5402_v23 = vpop.eup %5401  ;;  %v1474_v24 = vmul.f32 %v1470_v21, %v1458_v20  ;;  %v1623_v20 = vsel %vm831_vm1, %v1570_v17, 0  ;;  %v5851_v21 = vsub.f32 %v1620_v13, %v5844_v15 }
 0x27d   :  { %v5404_v25 = vpop.eup %5403  ;;  %v1479_v29 = vsel %vm715_vm2, %v1475_v22, 0.0  ;;  %v1473_v30 = vadd.f32 1.0, %v5402_v23  ;;  %v5856_v23 = vand.u32 4294901760, %v1623_v20 }
 0x27e   :  { %v1478_v31 = vsel %vm715_vm2, %v1474_v24, 0.0  ;;  %v1472_v34 = vadd.f32 1.0, %v5404_v25 }
 0x27f   :  { %v1480_v35 = vadd.f32 %v1479_v29, %v1478_v31  ;;  %v1477_v36 = vmul.f32 %v1473_v30, %v1461_v32  ;;  %v1533_v29 = vpop.permute.xlu0 %1532  ;;  %v1538_v30 = vpop.permute.xlu1 %1537  ;;  %v1721_v31 = vand.u32 4294901760, %v5851_v21 }
 0x280   :  { %v1476_v37 = vmul.f32 %v1472_v34, %v1460_v33  ;;  %v1573_v33 = vld [vmem:[%s6336_s3 + $0x28] sm:$0xff] }
 0x281   :  { %v1483_v40 = vsel %vm715_vm2, %v1477_v36, 0.0 }
 0x282   :  { %v1481_v38 = vsel %vm715_vm2, %v1476_v37, 0.0 }
 0x283   :  { %v1482_v39 = vadd.f32 %v1481_v38, %v1480_v35  ;;  %v5868_v35 = vsub.f32 %v1623_v20, %v5856_v23 }
 0x285   :  { %v1484_v41 = vadd.f32 %v1483_v40, %v1482_v39 }
 0x287   :  { %v1485_v42 = vrot.slane %v1484_v41, 4 }
 0x289   :  { %v1486_v43 = vadd.f32 %v1485_v42, %v1484_v41  ;;  %v1574_v41 = vld [vmem:[%s6336_s3 + $0x30] sm:$0xff]  ;;  %v5878_v42 = vsub.f32 %v5851_v21, %v1721_v31 }
 0x28b   :  { %v1487_v44 = vrot.slane %v1486_v43, 2 }
 0x28d   :  { %v1488_v45 = vadd.f32 %v1487_v44, %v1486_v43  ;;  %v1632_v44 = vsel %vm831_vm1, %v1573_v33, 0 }
 0x28f   :  { %v1489_v48 = vrot.slane %v1488_v45, 1 }
 0x291   :  { %v1490_v49 = vadd.f32 %v1489_v48, %v1488_v45 }
 0x293   :  { %v1491_v50 = vmul.f32 0.03125, %v1490_v49 }
 0x295   :  { %v1492_v51 = vsub.f32 %v1474_v24, %v1491_v50  ;;  %v1493_v52 = vsub.f32 %v1475_v22, %v1491_v50  ;;  %v1494_v53 = vsub.f32 %v1476_v37, %v1491_v50  ;;  %v1495_v54 = vsub.f32 %v1477_v36, %v1491_v50  ;;  %v1571_v22 = vld [vmem:[%s6336_s3 + $0x18] sm:$0xff]  ;;  %v1572_v24 = vld [vmem:[%s6336_s3 + $0x20] sm:$0xff] }
 0x296   :  { %v1626_v25 = vsel %vm831_vm1, %v1571_v22, 0  ;;  %v1629_v32 = vsel %vm831_vm1, %v1572_v24, 0 }
 0x297   :  { %v1496_v55 = vmul.f32 %v1492_v51, %v1492_v51  ;;  %v1497_v57 = vmul.f32 %v1493_v52, %v1493_v52  ;;  %v1498_v59 = vmul.f32 %v1494_v53, %v1494_v53  ;;  %v1499_v27 = vmul.f32 %v1495_v54, %v1495_v54 }
 0x298   :  { %v5870_v36 = vand.u32 4294901760, %v1626_v25  ;;  %v5880_v43 = vand.u32 4294901760, %v1629_v32 }
 0x299   :  { %v1500_v28 = vsel %vm715_vm2, %v1496_v55, 0.0  ;;  %v1501_v56 = vsel %vm715_vm2, %v1497_v57, 0.0  ;;  %v1503_v63 = vsel %vm715_vm2, %v1498_v59, 0.0  ;;  %v1505_v1 = vsel %vm715_vm2, %v1499_v27, 0.0 }
 0x29a   :  { %v1502_v60 = vadd.f32 %v1501_v56, %v1500_v28  ;;  %v1635_v55 = vsel %vm831_vm1, %v1574_v41, 0  ;;  %v1575_v56 = vld [vmem:[%s6336_s3 + $0x38] sm:$0xff] }
 0x29c   :  { %v1504_v0 = vadd.f32 %v1503_v63, %v1502_v60  ;;  %v1723_v60 = vand.u32 4294901760, %v5878_v42  ;;  %v5893_v63 = vsub.f32 %v1629_v32, %v5880_v43 }
 0x29e   :  { %v1506_v2 = vadd.f32 %v1505_v1, %v1504_v0  ;;  %v5895_v0 = vand.u32 4294901760, %v1632_v44  ;;  %v1751_v17 = vand.u32 4294901760, %v5893_v63 }
 0x2a0   :  { %v1507_v3 = vrot.slane %v1506_v2, 4 }
 0x2a2   :  { %v1508_v4 = vadd.f32 %v1507_v3, %v1506_v2 }
 0x2a4   :  { %v1509_v5 = vrot.slane %v1508_v4, 2 }
 0x2a6   :  { %v1510_v6 = vadd.f32 %v1509_v5, %v1508_v4 }
 0x2a8   :  { %v1511_v7 = vrot.slane %v1510_v6, 1 }
 0x2aa   :  { %v1512_v8 = vadd.f32 %v1511_v7, %v1510_v6  ;;  %v5901_v7 = vand.u32 4294901760, %v1635_v55 }
 0x2ac   :  { %v1513_v12 = vmul.f32 0.03125, %v1512_v8  ;;  %v1638_v8 = vsel %vm831_vm1, %v1575_v56, 0  ;;  %v5917_v32 = vsub.f32 %v1635_v55, %v5901_v7 }
 0x2ad   :  { %v5913_v24 = vand.u32 4294901760, %v1638_v8 }
 0x2ae   :  { %v1514_v14 = vadd.f32 1e-05, %v1513_v12  ;;  %v1771_v55 = vand.u32 4294901760, %v5917_v32 }
 0x2b0   :  { %5405 = vrsqrt.f32 %v1514_v14 }
 0x2ba   :  { %v5406_v34 = vpop.eup %5405 }
 0x2bb   :  { %v1516_v37 = vmul.f32 %v5406_v34, %v1492_v51  ;;  %v1517_v38 = vmul.f32 %v5406_v34, %v1493_v52  ;;  %v1518_v39 = vmul.f32 %v5406_v34, %v1494_v53  ;;  %v1519_v40 = vmul.f32 %v5406_v34, %v1495_v54  ;;  %v1557_v51 = vpop.permute.xlu0 %1556  ;;  %v1562_v52 = vpop.permute.xlu1 %1561 }
 0x2bc   :  { %v1731_v53 = vand.u32 4294901760, %v5868_v35  ;;  %v5885_v54 = vsub.f32 %v1626_v25, %v5870_v36 }
 0x2bd   :  { %v1540_v45 = vmul.f32 %v1523_v10, %v1516_v37  ;;  %v1541_v48 = vmul.f32 %v1528_v11, %v1517_v38  ;;  %v1542_v49 = vmul.f32 %v1533_v29, %v1518_v39  ;;  %v1543_v50 = vmul.f32 %v1538_v30, %v1519_v40 }
 0x2be   :  { %v1732_v5 = vsub.f32 %v5868_v35, %v1731_v53  ;;  %v1741_v6 = vand.u32 4294901760, %v5885_v54 }
 0x2bf   :  { %v1566_v57 = vadd.f32 %v1557_v51, %v1542_v49  ;;  %v1567_v59 = vadd.f32 %v1562_v52, %v1543_v50  ;;  %v1564_v27 = vadd.f32 %v1547_v18, %v1540_v45  ;;  %v1565_v28 = vadd.f32 %v1552_v19, %v1541_v48 }
 0x2c0   :  { %v5910_v18 = vsub.f32 %v1632_v44, %v5895_v0  ;;  %v1742_v37 = vsub.f32 %v5885_v54, %v1741_v6  ;;  %v1733_v41 = vand.u32 4294901760, %v1732_v5  ;;  %v5929_v49 = vsub.f32 %v1638_v8, %v5913_v24 }
 0x2c1   :  { %v1647_v1 = vand.u32 4294901760, %v1566_v57  ;;  %v1650_v2 = vand.u32 4294901760, %v1567_v59  ;;  %v1641_v3 = vand.u32 4294901760, %v1564_v27  ;;  %v1644_v4 = vand.u32 4294901760, %v1565_v28 }
 0x2c2   :  { %v1761_v48 = vand.u32 4294901760, %v5910_v18  ;;  %v1752_v52 = vsub.f32 %v5893_v63, %v1751_v17  ;;  %v1781_v56 = vand.u32 4294901760, %v5929_v49 }
 0x2c3   :  { %v5904_v9 = vpack.c.bf16 %v1650_v2, %v1647_v1  ;;  %v5906_v10 = vpack.c.bf16 %v1644_v4, %v1641_v3  ;;  %v1791_v11 = vsub.f32 %v1564_v27, %v1641_v3  ;;  %v1798_v12 = vsub.f32 %v1565_v28, %v1644_v4 }
 0x2c4   :  { %v1805_v13 = vsub.f32 %v1566_v57, %v1647_v1  ;;  %v1812_v14 = vsub.f32 %v1567_v59, %v1650_v2  ;;  %v1743_v27 = vand.u32 4294901760, %v1742_v37  ;;  %v1762_v28 = vsub.f32 %v5910_v18, %v1761_v48 }
 0x2c5   :  { %4965 = vmatprep.subr.bf16.mxu1 %v5906_v10  ;;  %v1792_v19 = vand.u32 4294901760, %v1791_v11  ;;  %v1799_v20 = vand.u32 4294901760, %v1798_v12  ;;  %v4980_v22 = vpack.c.bf16 %v1798_v12, %v1791_v11  ;;  %v1753_v1 = vand.u32 4294901760, %v1752_v52 }
 0x2c6   :  { %4967 = vmatpush3.bf16.msra.mxu1 %v5906_v10  ;;  %v1806_v25 = vand.u32 4294901760, %v1805_v13  ;;  %v1813_v29 = vand.u32 4294901760, %v1812_v14  ;;  %v4984_v30 = vpack.c.bf16 %v1812_v14, %v1805_v13  ;;  %v1772_v2 = vsub.f32 %v5917_v32, %v1771_v55 }
 0x2c7   :  { %4969 = vmatprep.subr.bf16.mxu1 %v5904_v9  ;;  %v1793_v33 = vsub.f32 %v1791_v11, %v1792_v19  ;;  %v1800_v34 = vsub.f32 %v1798_v12, %v1799_v20  ;;  %v5923_v38 = vpack.c.bf16 %v1799_v20, %v1792_v19  ;;  %v1763_v3 = vand.u32 4294901760, %v1762_v28  ;;  %v2441_v11 = vld [vmem:[%s6337_s4 + $0x38] sm:$0xff] }
 0x2c8   :  { %v1807_v39 = vsub.f32 %v1805_v13, %v1806_v25  ;;  %v1814_v40 = vsub.f32 %v1812_v14, %v1813_v29  ;;  %v5925_v42 = vpack.c.bf16 %v1813_v29, %v1806_v25  ;;  %v1773_v4 = vand.u32 4294901760, %v1772_v2  ;;  %v1584_v25 = vpop.permute.xlu1 %1583  ;;  %v1579_v29 = vpop.permute.xlu0 %1578 }
 0x2c9   :  { %v1794_v44 = vand.u32 4294901760, %v1793_v33  ;;  %v1801_v45 = vand.u32 4294901760, %v1800_v34  ;;  %v6046_v12 = vsel %vm2482_vm3, %v2441_v11, 0 }
 0x2ca   :  { %4971 = vmatpush3.bf16.msra.mxu1 %v5904_v9  ;;  %v1808_v50 = vand.u32 4294901760, %v1807_v39  ;;  %v1815_v51 = vand.u32 4294901760, %v1814_v40 }
 0x2cb   :  { %v4972_v57 = vpack.c.bf16 %v1801_v45, %v1794_v44  ;;  %5013 = vmatprep.subr.bf16.mxu1 %v5518_v16 }
 0x2cc   :  { %v4976_v59 = vpack.c.bf16 %v1815_v51, %v1808_v50 }
 0x2cd   :  { %4475 = vmatmul.mubr.f32.vlgmr.msra.gmra.mrb[4].mxu1 %v1723_v60  ;;  %4973 = vmatprep.subr.bf16.mxu0 %v4972_v57  ;;  %v1782_v60 = vsub.f32 %v5929_v49, %v1781_v56 }
 0x2ce   :  { %4975 = vmatpush3.bf16.msra.mxu0 %v4972_v57  ;;  %4477 = vmatprep.mubr.f32.mxu1 %v1733_v41 }
 0x2cf   :  { %4977 = vmatprep.subr.bf16.mxu0 %v4976_v59  ;;  %5015 = vmatpush3.bf16.msra.mxu1 %v5518_v16  ;;  %v1783_v5 = vand.u32 4294901760, %v1782_v60 }
 0x2d1   :  { %4478 = vmatmul.mubr.f32.gmra.mrb[6].mxu1 %v1743_v27 }
 0x2d2   :  { %4979 = vmatpush3.bf16.msra.mxu0 %v4976_v59  ;;  %4480 = vmatprep.mubr.f32.mxu1 %v1753_v1 }
 0x2d3   :  { %4981 = vmatprep.subr.bf16.mxu0 %v4980_v22 }
 0x2d5   :  { %4481 = vmatmul.mubr.f32.gmra.mrb[8].mxu1 %v1763_v3  ;;  %4495 = vmatmul.mubr.f32.vlgmr.msra.gmra.mrb[4].mxu0 %v5844_v15 }
 0x2d6   :  { %4983 = vmatpush3.bf16.msra.mxu0 %v4980_v22  ;;  %4483 = vmatprep.mubr.f32.mxu1 %v1773_v4 }
 0x2d7   :  { %4985 = vmatprep.subr.bf16.mxu0 %v4984_v30  ;;  %4497 = vmatprep.mubr.f32.mxu0 %v5856_v23 }
 0x2d9   :  { %4484 = vmatmul.mubr.f32.gmra.mrb[10].mxu1 %v1783_v5  ;;  %4498 = vmatmul.mubr.f32.gmra.mrb[6].mxu0 %v5870_v36 }
 0x2da   :  { %4987 = vmatpush3.bf16.msra.mxu0 %v4984_v30  ;;  %4500 = vmatprep.mubr.f32.mxu0 %v5880_v43  ;;  %v1594_v30 = vpop.permute.xlu1 %1593 }
 0x2db   :  { %4989 = vmatprep.subr.bf16.mxu0 %v5906_v10 }
 0x2dd   :  { %4501 = vmatmul.mubr.f32.gmra.mrb[8].mxu0 %v5895_v0 }
 0x2de   :  { %4503 = vmatprep.mubr.f32.mxu0 %v5901_v7  ;;  %v1604_v44 = vpop.permute.xlu1 %1603 }
 0x2e1   :  { %4504 = vmatmul.mubr.f32.gmra.mrb[10].mxu0 %v5913_v24 }
 0x2e2   :  { %4514 = vmatprep.mubr.f32.mxu0 %v5825_v62  ;;  %v2434_v62 = vld [vmem:[%s6337_s4] sm:$0xff]  ;;  %v1614_v3 = vpop.permute.xlu1 %1613 }
 0x2e5   :  { %4515 = vmatmul.mubr.f32.vlgmr.msra.gmra.mrb[4].mxu0 %v5851_v21 }
 0x2e6   :  { %4991 = vmatpush3.bf16.msra.mxu0 %v5906_v10  ;;  %4517 = vmatprep.mubr.f32.mxu0 %v5868_v35 }
 0x2e7   :  { %4993 = vmatprep.subr.bf16.mxu0 %v5904_v9 }
 0x2e9   :  { %4518 = vmatmul.mubr.f32.gmra.mrb[6].mxu0 %v5885_v54 }
 0x2ea   :  { %4995 = vmatpush3.bf16.msra.mxu0 %v5904_v9  ;;  %4520 = vmatprep.mubr.f32.mxu0 %v5893_v63 }
 0x2eb   :  { %4997 = vmatprep.subr.bf16.mxu0 %v5923_v38 }
 0x2ed   :  { %4521 = vmatmul.mubr.f32.gmra.mrb[8].mxu0 %v5910_v18 }
 0x2ee   :  { %4523 = vmatprep.mubr.f32.mxu0 %v5917_v32  ;;  %v1589_v32 = vpop.permute.xlu0 %1588 }
 0x2f1   :  { %4524 = vmatmul.mubr.f32.gmra.mrb[10].mxu0 %v5929_v49 }
 0x2f2   :  { %4534 = vmatprep.mubr.f32.mxu0 %v1711_v26  ;;  %v2435_v26 = vld [vmem:[%s6337_s4 + $0x8] sm:$0xff]  ;;  %v1599_v49 = vpop.permute.xlu0 %1598 }
 0x2f3   :  { %v2487_v21 = vsel %vm2482_vm3, %v2435_v26, 0 }
 0x2f4   :  { %v6048_v41 = vand.u32 4294901760, %v2487_v21 }
 0x2f5   :  { %4535 = vmatmul.mubr.f32.vlgmr.msra.gmra.mrb[4].mxu0 %v1721_v31 }
 0x2f6   :  { %4999 = vmatpush3.bf16.msra.mxu0 %v5923_v38  ;;  %4537 = vmatprep.mubr.f32.mxu0 %v1731_v53  ;;  %v2437_v53 = vld [vmem:[%s6337_s4 + $0x18] sm:$0xff]  ;;  %v1609_v5 = vpop.permute.xlu0 %1608 }
 0x2f7   :  { %5001 = vmatprep.subr.bf16.mxu0 %v5925_v42  ;;  %v2493_v63 = vsel %vm2482_vm3, %v2437_v53, 0 }
 0x2f9   :  { %4538 = vmatmul.mubr.f32.gmra.mrb[6].mxu0 %v1741_v6 }
 0x2fa   :  { %5003 = vmatpush3.bf16.msra.mxu0 %v5925_v42  ;;  %4540 = vmatprep.mubr.f32.mxu0 %v1751_v17 }
 0x2fb   :  { %5005 = vmatprep.subr.bf16.mxu0 %v5906_v10 }
 0x2fd   :  { %4541 = vmatmul.mubr.f32.gmra.mrb[8].mxu0 %v1761_v48 }
 0x2fe   :  { %4543 = vmatprep.mubr.f32.mxu0 %v1771_v55  ;;  %v6051_v55 = vsub.f32 %v2487_v21, %v6048_v41 }
 0x300   :  { %v2594_v4 = vand.u32 4294901760, %v6051_v55 }
 0x301   :  { %4544 = vmatmul.mubr.f32.gmra.mrb[10].mxu0 %v1781_v56  ;;  %v6055_v56 = vand.u32 4294901760, %v2493_v63 }
 0x302   :  { %4554 = vmatprep.mubr.f32.mxu0 %v5822_v61  ;;  %v6067_v11 = vsub.f32 %v6051_v55, %v2594_v4 }
 0x305   :  { %4555 = vmatmul.mubr.f32.vlgmr.msra.gmra.mrb[4].mxu0 %v5844_v15 }
 0x306   :  { %5007 = vmatpush3.bf16.msra.mxu0 %v5906_v10  ;;  %4557 = vmatprep.mubr.f32.mxu0 %v5856_v23 }
 0x307   :  { %5009 = vmatprep.subr.bf16.mxu0 %v5904_v9 }
 0x309   :  { %4558 = vmatmul.mubr.f32.gmra.mrb[6].mxu0 %v5870_v36 }
 0x30a   :  { %5011 = vmatpush3.bf16.msra.mxu0 %v5904_v9  ;;  %4560 = vmatprep.mubr.f32.mxu0 %v5880_v43  ;;  %v2440_v9 = vld [vmem:[%s6337_s4 + $0x30] sm:$0xff] }
 0x30b   :  { %v6040_v10 = vsel %vm2482_vm3, %v2440_v9, 0 }
 0x30d   :  { %4561 = vmatmul.mubr.f32.gmra.mrb[8].mxu0 %v5895_v0 }
 0x30e   :  { %4563 = vmatprep.mubr.f32.mxu0 %v5901_v7 }
 0x311   :  { %4564 = vmatmul.mubr.f32.gmra.mrb[10].mxu0 %v5913_v24 }
 0x312   :  { %4574 = vmatprep.mubr.f32.mxu0 %v5822_v61  ;;  %v2484_v61 = vsel %vm2482_vm3, %v2434_v62, 0 }
 0x315   :  { %4575 = vmatmul.mubr.f32.vlgmr.msra.gmra.mrb[4].mxu0 %v5844_v15  ;;  %v6006_v15 = vand.u32 4294901760, %v2484_v61 }
 0x316   :  { %4577 = vmatprep.mubr.f32.mxu0 %v5856_v23 }
 0x317   :  { %v6010_v23 = vsub.f32 %v2484_v61, %v6006_v15 }
 0x319   :  { %4578 = vmatmul.mubr.f32.gmra.mrb[6].mxu0 %v5870_v36  ;;  %v2584_v31 = vand.u32 4294901760, %v6010_v23  ;;  %v2436_v36 = vld [vmem:[%s6337_s4 + $0x10] sm:$0xff] }
 0x31a   :  { %4580 = vmatprep.mubr.f32.mxu0 %v5880_v43  ;;  %v2490_v43 = vsel %vm2482_vm3, %v2436_v36, 0 }
 0x31b   :  { %v2585_v35 = vsub.f32 %v6010_v23, %v2584_v31  ;;  %v6053_v59 = vand.u32 4294901760, %v2490_v43 }
 0x31d   :  { %4581 = vmatmul.mubr.f32.gmra.mrb[8].mxu0 %v5895_v0  ;;  %v2586_v54 = vand.u32 4294901760, %v2585_v35  ;;  %v2438_v0 = vld [vmem:[%s6337_s4 + $0x20] sm:$0xff]  ;;  %v6059_v61 = vsub.f32 %v2490_v43, %v6053_v59  ;;  %v6062_v35 = vsub.f32 %v2493_v63, %v6055_v56 }
 0x31e   :  { %4583 = vmatprep.mubr.f32.mxu0 %v5901_v7  ;;  %v6028_v6 = vsel %vm2482_vm3, %v2438_v0, 0  ;;  %v2439_v7 = vld [vmem:[%s6337_s4 + $0x28] sm:$0xff] }
 0x31f   :  { %4606 = vmatprep.mubr.f32.mxu1 %v2586_v54  ;;  %v6034_v8 = vsel %vm2482_vm3, %v2439_v7, 0  ;;  %v2604_v43 = vand.u32 4294901760, %v6059_v61  ;;  %v2614_v63 = vand.u32 4294901760, %v6062_v35 }
 0x321   :  { %4584 = vmatmul.mubr.f32.gmra.mrb[10].mxu0 %v5913_v24 }
 0x3a0   :  { %v4476_v13 = vpop.f32.mrb[4].mxu1 }
 0x3a1   :  { %v1715_v14 = vpop.f32.mrb[5].mxu1  ;;  %v1726_v33 = vadd.f32 %v4476_v13, %v1584_v25  ;;  %v2596_v25 = vand.u32 4294901760, %v6067_v11 }
 0x3a2   :  { %v1716_v34 = vadd.f32 %v1715_v14, %v1579_v29 }
 0x3a4   :  { %v4479_v17 = vpop.f32.mrb[6].mxu1 }
 0x3a5   :  { %v1735_v18 = vpop.f32.mrb[7].mxu1  ;;  %v1746_v42 = vadd.f32 %v4479_v17, %v1594_v30  ;;  %v6072_v17 = vand.u32 4294901760, %v6028_v6  ;;  %v6078_v30 = vand.u32 4294901760, %v6034_v8 }
 0x3a6   :  { %v1736_v45 = vadd.f32 %v1735_v18, %v1589_v32 }
 0x3a8   :  { %v4482_v19 = vpop.f32.mrb[8].mxu1 }
 0x3a9   :  { %v1755_v20 = vpop.f32.mrb[9].mxu1  ;;  %v1766_v57 = vadd.f32 %v4482_v19, %v1604_v44 }
 0x3aa   :  { %v1756_v27 = vadd.f32 %v1755_v20, %v1599_v49 }
 0x3ac   :  { %v4485_v22 = vpop.f32.mrb[10].mxu1 }
 0x3ad   :  { %v1775_v24 = vpop.f32.mrb[11].mxu1  ;;  %v1786_v62 = vadd.f32 %v4485_v22, %v1614_v3 }
 0x3ae   :  { %v1776_v26 = vadd.f32 %v1775_v24, %v1609_v5 }
 0x3e8   :  { %v4576_v37 = vpop.f32.mrb[4].mxu0 }
 0x3e9   :  { %v5237_v38 = vadd.f32 %v4576_v37, %v1726_v33  ;;  %v2380_v39 = vpop.f32.mrb[5].mxu0 }
 0x3ea   :  { %v5239_v40 = vadd.f32 %v2380_v39, %v1716_v34  ;;  %v6084_v34 = vsub.f32 %v6059_v61, %v2604_v43 }
 0x3eb   :  { %5407 = vtanh.f32 %v5237_v38 }
 0x3ec   :  { %5409 = vtanh.f32 %v5239_v40  ;;  %v4579_v48 = vpop.f32.mrb[6].mxu0  ;;  %v6092_v40 = vsub.f32 %v6062_v35, %v2614_v63 }
 0x3ed   :  { %v5241_v50 = vadd.f32 %v4579_v48, %v1746_v42  ;;  %v2392_v51 = vpop.f32.mrb[7].mxu0  ;;  %v6096_v42 = vsub.f32 %v6028_v6, %v6072_v17 }
 0x3ee   :  { %v5243_v52 = vadd.f32 %v2392_v51, %v1736_v45 }
 0x3ef   :  { %5411 = vtanh.f32 %v5241_v50 }
 0x3f0   :  { %5413 = vtanh.f32 %v5243_v52  ;;  %v4582_v28 = vpop.f32.mrb[8].mxu0 }
 0x3f1   :  { %v5245_v1 = vadd.f32 %v4582_v28, %v1766_v57  ;;  %v2404_v2 = vpop.f32.mrb[9].mxu0  ;;  %v6104_v28 = vsub.f32 %v6034_v8, %v6078_v30 }
 0x3f2   :  { %v5247_v60 = vadd.f32 %v2404_v2, %v1756_v27 }
 0x3f3   :  { %5415 = vtanh.f32 %v5245_v1 }
 0x3f4   :  { %5417 = vtanh.f32 %v5247_v60  ;;  %v4585_v21 = vpop.f32.mrb[10].mxu0 }
 0x3f5   :  { %v5408_v36 = vpop.eup %5407  ;;  %v5249_v53 = vadd.f32 %v4585_v21, %v1786_v62  ;;  %v2416_v54 = vpop.f32.mrb[11].mxu0  ;;  %v6111_v62 = vand.u32 4294901760, %v6040_v10 }
 0x3f6   :  { %v5410_v0 = vpop.eup %5409  ;;  %v2517_v7 = vand.u32 4294901760, %v5408_v36  ;;  %v5251_v9 = vadd.f32 %v2416_v54, %v1776_v26  ;;  %v6114_v26 = vand.u32 4294901760, %v6046_v12 }
 0x3f7   :  { %v2514_v13 = vand.u32 4294901760, %v5410_v0  ;;  %5419 = vtanh.f32 %v5249_v53 }
 0x3f8   :  { %5421 = vtanh.f32 %v5251_v9  ;;  %v2685_v14 = vsub.f32 %v5408_v36, %v2517_v7 }
 0x3f9   :  { %v5412_v18 = vpop.eup %5411  ;;  %v6074_v19 = vpack.c.bf16 %v2517_v7, %v2514_v13  ;;  %v2678_v20 = vsub.f32 %v5410_v0, %v2514_v13 }
 0x3fa   :  { %v5414_v22 = vpop.eup %5413  ;;  %v2523_v24 = vand.u32 4294901760, %v5412_v18  ;;  %v2686_v29 = vand.u32 4294901760, %v2685_v14 }
 0x3fb   :  { %v2520_v32 = vand.u32 4294901760, %v5414_v22  ;;  %5017 = vmatprep.subr.bf16.mxu1 %v6074_v19  ;;  %v2679_v33 = vand.u32 4294901760, %v2678_v20  ;;  %v6086_v37 = vpack.c.bf16 %v2685_v14, %v2678_v20 }
 0x3fc   :  { %5019 = vmatpush3.bf16.msra.mxu1 %v6074_v19  ;;  %v2687_v38 = vsub.f32 %v2685_v14, %v2686_v29  ;;  %v2699_v39 = vsub.f32 %v5412_v18, %v2523_v24 }
 0x3fd   :  { %v5416_v44 = vpop.eup %5415  ;;  %v6098_v45 = vpack.c.bf16 %v2523_v24, %v2520_v32  ;;  %v2680_v48 = vsub.f32 %v2678_v20, %v2679_v33  ;;  %v2692_v49 = vsub.f32 %v5414_v22, %v2520_v32  ;;  %v6100_v50 = vpack.c.bf16 %v2686_v29, %v2679_v33 }
 0x3fe   :  { %v5418_v51 = vpop.eup %5417  ;;  %v2529_v52 = vand.u32 4294901760, %v5416_v44  ;;  %v2688_v57 = vand.u32 4294901760, %v2687_v38  ;;  %v2700_v27 = vand.u32 4294901760, %v2699_v39  ;;  %v2624_v32 = vand.u32 4294901760, %v6096_v42 }
 0x3ff   :  { %v2526_v1 = vand.u32 4294901760, %v5418_v51  ;;  %5021 = vmatprep.subr.bf16.mxu1 %v6098_v45  ;;  %v2681_v6 = vand.u32 4294901760, %v2680_v48  ;;  %v2693_v2 = vand.u32 4294901760, %v2692_v49  ;;  %v6107_v3 = vpack.c.bf16 %v2699_v39, %v2692_v49 }
 0x400   :  { %5023 = vmatpush3.bf16.msra.mxu1 %v6098_v45  ;;  %v2701_v60 = vsub.f32 %v2699_v39, %v2700_v27  ;;  %v2713_v5 = vsub.f32 %v5416_v44, %v2529_v52  ;;  %v6127_v38 = vsub.f32 %v6040_v10, %v6111_v62 }
 0x401   :  { %v5420_v21 = vpop.eup %5419  ;;  %v6116_v8 = vpack.c.bf16 %v2529_v52, %v2526_v1  ;;  %v5036_v36 = vpack.c.bf16 %v2688_v57, %v2681_v6  ;;  %v2694_v53 = vsub.f32 %v2692_v49, %v2693_v2  ;;  %v2706_v54 = vsub.f32 %v5418_v51, %v2526_v1 }
 0x402   :  { %v5422_v0 = vpop.eup %5421  ;;  %v2535_v7 = vand.u32 4294901760, %v5420_v21  ;;  %v2702_v9 = vand.u32 4294901760, %v2701_v60  ;;  %v2714_v13 = vand.u32 4294901760, %v2713_v5  ;;  %v6118_v14 = vpack.c.bf16 %v2700_v27, %v2693_v2 }
 0x403   :  { %v2532_v18 = vand.u32 4294901760, %v5422_v0  ;;  %5025 = vmatprep.subr.bf16.mxu1 %v6116_v8  ;;  %v2695_v20 = vand.u32 4294901760, %v2694_v53  ;;  %v2707_v22 = vand.u32 4294901760, %v2706_v54  ;;  %v6121_v24 = vpack.c.bf16 %v2713_v5, %v2706_v54 }
 0x404   :  { %5027 = vmatpush3.bf16.msra.mxu1 %v6116_v8  ;;  %v2715_v29 = vsub.f32 %v2713_v5, %v2714_v13  ;;  %v2727_v33 = vsub.f32 %v5420_v21, %v2535_v7  ;;  %v2634_v52 = vand.u32 4294901760, %v6104_v28  ;;  %v6137_v2 = vsub.f32 %v6046_v12, %v6114_v26 }
 0x405   :  { %v6129_v39 = vpack.c.bf16 %v2535_v7, %v2532_v18  ;;  %v5040_v44 = vpack.c.bf16 %v2702_v9, %v2695_v20  ;;  %v2708_v48 = vsub.f32 %v2706_v54, %v2707_v22  ;;  %v2720_v49 = vsub.f32 %v5422_v0, %v2532_v18 }
 0x406   :  { %v2716_v51 = vand.u32 4294901760, %v2715_v29  ;;  %v2728_v57 = vand.u32 4294901760, %v2727_v33  ;;  %v6132_v27 = vpack.c.bf16 %v2714_v13, %v2707_v22  ;;  %v2606_v60 = vand.u32 4294901760, %v6084_v34 }
 0x407   :  { %5029 = vmatprep.subr.bf16.mxu1 %v6129_v39  ;;  %v2709_v1 = vand.u32 4294901760, %v2708_v48  ;;  %v2721_v6 = vand.u32 4294901760, %v2720_v49  ;;  %v5068_v10 = vpack.c.bf16 %v2727_v33, %v2720_v49  ;;  %v2625_v5 = vsub.f32 %v6096_v42, %v2624_v32 }
 0x408   :  { %5031 = vmatpush3.bf16.msra.mxu1 %v6129_v39  ;;  %v2729_v21 = vsub.f32 %v2727_v33, %v2728_v57  ;;  %v2644_v53 = vand.u32 4294901760, %v6127_v38  ;;  %v2616_v9 = vand.u32 4294901760, %v6092_v40  ;;  %v2635_v34 = vsub.f32 %v6104_v28, %v2634_v52 }
 0x409   :  { %5033 = vmatprep.subr.bf16.mxu1 %v5576_v46  ;;  %v5044_v54 = vpack.c.bf16 %v2716_v51, %v2709_v1  ;;  %v2722_v0 = vsub.f32 %v2720_v49, %v2721_v6  ;;  %v6146_v7 = vpack.c.bf16 %v2728_v57, %v2721_v6  ;;  %v2654_v18 = vand.u32 4294901760, %v6137_v2 }
 0x40a   :  { %v2730_v12 = vand.u32 4294901760, %v2729_v21  ;;  %v2626_v20 = vand.u32 4294901760, %v2625_v5  ;;  %v2645_v22 = vsub.f32 %v6127_v38, %v2644_v53 }
 0x40b   :  { %4607 = vmatmul.mubr.f32.vlgmr.msra.gmra.mrb[12].mxu1 %v2596_v25  ;;  %v2723_v13 = vand.u32 4294901760, %v2722_v0  ;;  %v2636_v25 = vand.u32 4294901760, %v2635_v34  ;;  %v2655_v40 = vsub.f32 %v6137_v2, %v2654_v18 }
 0x40c   :  { %5035 = vmatpush3.bf16.msra.mxu1 %v5576_v46  ;;  %4609 = vmatprep.mubr.f32.mxu1 %v2606_v60  ;;  %v2646_v29 = vand.u32 4294901760, %v2645_v22 }
 0x40d   :  { %5037 = vmatprep.subr.bf16.mxu1 %v5036_v36  ;;  %v5048_v11 = vpack.c.bf16 %v2730_v12, %v2723_v13  ;;  %v2656_v46 = vand.u32 4294901760, %v2655_v40 }
 0x40f   :  { %4610 = vmatmul.mubr.f32.gmra.mrb[14].mxu1 %v2616_v9 }
 0x410   :  { %5039 = vmatpush3.bf16.msra.mxu1 %v5036_v36  ;;  %4612 = vmatprep.mubr.f32.mxu1 %v2626_v20 }
 0x411   :  { %5041 = vmatprep.subr.bf16.mxu1 %v5040_v44 }
 0x413   :  { %4613 = vmatmul.mubr.f32.gmra.mrb[16].mxu1 %v2636_v25 }
 0x414   :  { %5043 = vmatpush3.bf16.msra.mxu1 %v5040_v44  ;;  %4615 = vmatprep.mubr.f32.mxu1 %v2646_v29 }
 0x415   :  { %5045 = vmatprep.subr.bf16.mxu1 %v5044_v54 }
 0x417   :  { %4616 = vmatmul.mubr.f32.gmra.mrb[18].mxu1 %v2656_v46 }
 0x418   :  { %5047 = vmatpush3.bf16.msra.mxu1 %v5044_v54  ;;  %4638 = vmatprep.mubr.f32.mxu1 %v6006_v15 }
 0x419   :  { %5049 = vmatprep.subr.bf16.mxu1 %v5048_v11 }
 0x41c   :  { %5051 = vmatpush3.bf16.msra.mxu1 %v5048_v11 }
 0x41d   :  { %5053 = vmatprep.subr.bf16.mxu1 %v5580_v47 }
 0x41f   :  { %4639 = vmatmul.mubr.f32.vlgmr.msra.gmra.mrb[12].mxu1 %v6048_v41 }
 0x420   :  { %5055 = vmatpush3.bf16.msra.mxu1 %v5580_v47  ;;  %4641 = vmatprep.mubr.f32.mxu1 %v6053_v59  ;;  %v3380_v47 = vld [vmem:[%s6338_s5 + $0x8] sm:$0xff] }
 0x421   :  { %5057 = vmatprep.subr.bf16.mxu1 %v6086_v37 }
 0x423   :  { %4642 = vmatmul.mubr.f32.gmra.mrb[14].mxu1 %v6055_v56 }
 0x424   :  { %5059 = vmatpush3.bf16.msra.mxu1 %v6086_v37  ;;  %4644 = vmatprep.mubr.f32.mxu1 %v6072_v17 }
 0x425   :  { %5061 = vmatprep.subr.bf16.mxu1 %v6107_v3 }
 0x427   :  { %4645 = vmatmul.mubr.f32.gmra.mrb[16].mxu1 %v6078_v30 }
 0x428   :  { %5063 = vmatpush3.bf16.msra.mxu1 %v6107_v3  ;;  %4647 = vmatprep.mubr.f32.mxu1 %v6111_v62 }
 0x429   :  { %5065 = vmatprep.subr.bf16.mxu1 %v6121_v24 }
 0x42b   :  { %4648 = vmatmul.mubr.f32.gmra.mrb[18].mxu1 %v6114_v26 }
 0x42c   :  { %5067 = vmatpush3.bf16.msra.mxu1 %v6121_v24  ;;  %4670 = vmatprep.mubr.f32.mxu1 %v6010_v23 }
 0x42d   :  { %5069 = vmatprep.subr.bf16.mxu1 %v5068_v10 }
 0x430   :  { %5071 = vmatpush3.bf16.msra.mxu1 %v5068_v10 }
 0x431   :  { %5073 = vmatprep.subr.bf16.mxu1 %v5518_v16 }
 0x433   :  { %4671 = vmatmul.mubr.f32.vlgmr.msra.gmra.mrb[12].mxu1 %v6051_v55 }
 0x434   :  { %5075 = vmatpush3.bf16.msra.mxu1 %v5518_v16  ;;  %4673 = vmatprep.mubr.f32.mxu1 %v6059_v61 }
 0x435   :  { %5077 = vmatprep.subr.bf16.mxu1 %v6074_v19 }
 0x437   :  { %4674 = vmatmul.mubr.f32.gmra.mrb[14].mxu1 %v6062_v35 }
 0x438   :  { %5079 = vmatpush3.bf16.msra.mxu1 %v6074_v19  ;;  %4676 = vmatprep.mubr.f32.mxu1 %v6096_v42 }
 0x439   :  { %5081 = vmatprep.subr.bf16.mxu1 %v6098_v45 }
 0x43b   :  { %4677 = vmatmul.mubr.f32.gmra.mrb[16].mxu1 %v6104_v28 }
 0x43c   :  { %5083 = vmatpush3.bf16.msra.mxu1 %v6098_v45  ;;  %4679 = vmatprep.mubr.f32.mxu1 %v6127_v38 }
 0x43d   :  { %5085 = vmatprep.subr.bf16.mxu1 %v6116_v8 }
 0x43f   :  { %4680 = vmatmul.mubr.f32.gmra.mrb[18].mxu1 %v6137_v2 }
 0x440   :  { %5087 = vmatpush3.bf16.msra.mxu1 %v6116_v8  ;;  %4702 = vmatprep.mubr.f32.mxu1 %v2584_v31 }
 0x441   :  { %5089 = vmatprep.subr.bf16.mxu1 %v6129_v39 }
 0x444   :  { %5091 = vmatpush3.bf16.msra.mxu1 %v6129_v39 }
 0x445   :  { %5093 = vmatprep.subr.bf16.mxu1 %v5616_v58 }
 0x447   :  { %4703 = vmatmul.mubr.f32.vlgmr.msra.gmra.mrb[12].mxu1 %v2594_v4  ;;  %v2445_v4 = vpop.permute.xlu0 %2444 }
 0x448   :  { %5095 = vmatpush3.bf16.msra.mxu1 %v5616_v58  ;;  %4705 = vmatprep.mubr.f32.mxu1 %v2604_v43 }
 0x449   :  { %5097 = vmatprep.subr.bf16.mxu1 %v6100_v50 }
 0x44b   :  { %4706 = vmatmul.mubr.f32.gmra.mrb[14].mxu1 %v2614_v63  ;;  %v2455_v43 = vpop.permute.xlu0 %2454 }
 0x44c   :  { %5099 = vmatpush3.bf16.msra.mxu1 %v6100_v50  ;;  %4708 = vmatprep.mubr.f32.mxu1 %v2624_v32 }
 0x44d   :  { %5101 = vmatprep.subr.bf16.mxu1 %v6118_v14 }
 0x44f   :  { %4709 = vmatmul.mubr.f32.gmra.mrb[16].mxu1 %v2634_v52  ;;  %v2465_v28 = vpop.permute.xlu0 %2464 }
 0x450   :  { %5103 = vmatpush3.bf16.msra.mxu1 %v6118_v14  ;;  %4711 = vmatprep.mubr.f32.mxu1 %v2644_v53 }
 0x451   :  { %5105 = vmatprep.subr.bf16.mxu1 %v6132_v27 }
 0x453   :  { %4712 = vmatmul.mubr.f32.gmra.mrb[18].mxu1 %v2654_v18  ;;  %v2475_v33 = vpop.permute.xlu0 %2474 }
 0x454   :  { %5107 = vmatpush3.bf16.msra.mxu1 %v6132_v27  ;;  %4734 = vmatprep.mubr.f32.mxu1 %v6006_v15 }
 0x455   :  { %5109 = vmatprep.subr.bf16.mxu1 %v6146_v7 }
 0x458   :  { %5111 = vmatpush3.bf16.msra.mxu1 %v6146_v7 }
 0x459   :  { %5113 = vmatprep.subr.bf16.mxu1 %v5518_v16 }
 0x45b   :  { %4735 = vmatmul.mubr.f32.vlgmr.msra.gmra.mrb[12].mxu1 %v6048_v41 }
 0x45c   :  { %5115 = vmatpush3.bf16.msra.mxu1 %v5518_v16  ;;  %4737 = vmatprep.mubr.f32.mxu1 %v6053_v59  ;;  %v3379_v16 = vld [vmem:[%s6338_s5] sm:$0xff] }
 0x45d   :  { %5117 = vmatprep.subr.bf16.mxu1 %v6074_v19  ;;  %v3393_v58 = vsel %vm3391_vm4, %v3379_v16, 0 }
 0x45e   :  { %v6254_v23 = vand.u32 4294901760, %v3393_v58 }
 0x45f   :  { %4738 = vmatmul.mubr.f32.gmra.mrb[14].mxu1 %v6055_v56 }
 0x460   :  { %5119 = vmatpush3.bf16.msra.mxu1 %v6074_v19  ;;  %4740 = vmatprep.mubr.f32.mxu1 %v6072_v17  ;;  %v6257_v31 = vsub.f32 %v3393_v58, %v6254_v23 }
 0x461   :  { %5121 = vmatprep.subr.bf16.mxu1 %v6098_v45  ;;  %4813 = vmatprep.mubr.f32.mxu0 %v6254_v23 }
 0x463   :  { %4741 = vmatmul.mubr.f32.gmra.mrb[16].mxu1 %v6078_v30 }
 0x464   :  { %5123 = vmatpush3.bf16.msra.mxu1 %v6098_v45  ;;  %4743 = vmatprep.mubr.f32.mxu1 %v6111_v62 }
 0x465   :  { %5125 = vmatprep.subr.bf16.mxu1 %v6116_v8 }
 0x467   :  { %4744 = vmatmul.mubr.f32.gmra.mrb[18].mxu1 %v6114_v26 }
 0x468   :  { %5127 = vmatpush3.bf16.msra.mxu1 %v6116_v8  ;;  %4766 = vmatprep.mubr.f32.mxu1 %v6006_v15  ;;  %v3396_v15 = vsel %vm3391_vm4, %v3380_v47, 0 }
 0x469   :  { %5129 = vmatprep.subr.bf16.mxu1 %v6129_v39  ;;  %v6264_v24 = vand.u32 4294901760, %v3396_v15 }
 0x46b   :  { %v6267_v57 = vsub.f32 %v3396_v15, %v6264_v24 }
 0x46c   :  { %5131 = vmatpush3.bf16.msra.mxu1 %v6129_v39 }
 0x46d   :  { %v3483_v7 = vand.u32 4294901760, %v6267_v57 }
 0x46f   :  { %4767 = vmatmul.mubr.f32.vlgmr.msra.gmra.mrb[12].mxu1 %v6048_v41  ;;  %v3473_v41 = vand.u32 4294901760, %v6257_v31  ;;  %v3484_v58 = vsub.f32 %v6267_v57, %v3483_v7 }
 0x470   :  { %4769 = vmatprep.mubr.f32.mxu1 %v6053_v59 }
 0x471   :  { %v3474_v55 = vsub.f32 %v6257_v31, %v3473_v41 }
 0x473   :  { %4770 = vmatmul.mubr.f32.gmra.mrb[14].mxu1 %v6055_v56  ;;  %v3475_v59 = vand.u32 4294901760, %v3474_v55  ;;  %v2450_v56 = vpop.permute.xlu1 %2449 }
 0x474   :  { %4772 = vmatprep.mubr.f32.mxu1 %v6072_v17 }
 0x477   :  { %4773 = vmatmul.mubr.f32.gmra.mrb[16].mxu1 %v6078_v30  ;;  %v2460_v61 = vpop.permute.xlu1 %2459 }
 0x478   :  { %4775 = vmatprep.mubr.f32.mxu1 %v6111_v62 }
 0x47b   :  { %4776 = vmatmul.mubr.f32.gmra.mrb[18].mxu1 %v6114_v26  ;;  %v2470_v45 = vpop.permute.xlu1 %2469 }
 0x47c   :  { %4794 = vmatprep.mubr.f32.mxu1 %v3475_v59 }
 0x47f   :  { %v2480_v36 = vpop.permute.xlu1 %2479 }
 0x542   :  { %v4768_v35 = vpop.f32.mrb[12].mxu1 }
 0x543   :  { %v5252_v63 = vadd.f32 %v4768_v35, %v2450_v56  ;;  %v3325_v17 = vpop.f32.mrb[13].mxu1 }
 0x544   :  { %v5253_v19 = vadd.f32 %v3325_v17, %v2445_v4 }
 0x545   :  { %5423 = vtanh.f32 %v5252_v63 }
 0x546   :  { %5425 = vtanh.f32 %v5253_v19  ;;  %v4771_v30 = vpop.f32.mrb[14].mxu1 }
 0x547   :  { %v5254_v37 = vadd.f32 %v4771_v30, %v2460_v61  ;;  %v3337_v42 = vpop.f32.mrb[15].mxu1 }
 0x548   :  { %v5255_v50 = vadd.f32 %v3337_v42, %v2455_v43 }
 0x549   :  { %5427 = vtanh.f32 %v5254_v37 }
 0x54a   :  { %5429 = vtanh.f32 %v5255_v50  ;;  %v4774_v3 = vpop.f32.mrb[16].mxu1 }
 0x54b   :  { %v5256_v62 = vadd.f32 %v4774_v3, %v2470_v45  ;;  %v3349_v26 = vpop.f32.mrb[17].mxu1 }
 0x54c   :  { %v5257_v8 = vadd.f32 %v3349_v26, %v2465_v28 }
 0x54d   :  { %5431 = vtanh.f32 %v5256_v62 }
 0x54e   :  { %5433 = vtanh.f32 %v5257_v8  ;;  %v4777_v14 = vpop.f32.mrb[18].mxu1 }
 0x54f   :  { %v5424_v32 = vpop.eup %5423  ;;  %v5258_v38 = vadd.f32 %v4777_v14, %v2480_v36  ;;  %v3361_v39 = vpop.f32.mrb[19].mxu1 }
 0x550   :  { %v5426_v44 = vpop.eup %5425  ;;  %v3402_v48 = vand.u32 4294901760, %v5424_v32  ;;  %v5259_v49 = vadd.f32 %v3361_v39, %v2475_v33  ;;  %v3485_v33 = vand.u32 4294901760, %v3484_v58 }
 0x551   :  { %v3399_v51 = vand.u32 4294901760, %v5426_v44  ;;  %5435 = vtanh.f32 %v5258_v38 }
 0x552   :  { %5437 = vtanh.f32 %v5259_v49  ;;  %v3500_v52 = vsub.f32 %v5424_v32, %v3402_v48 }
 0x553   :  { %v5428_v27 = vpop.eup %5427  ;;  %v6269_v1 = vpack.c.bf16 %v3402_v48, %v3399_v51  ;;  %v3493_v6 = vsub.f32 %v5426_v44, %v3399_v51 }
 0x554   :  { %v5430_v2 = vpop.eup %5429  ;;  %v3408_v10 = vand.u32 4294901760, %v5428_v27  ;;  %v3501_v60 = vand.u32 4294901760, %v3500_v52 }
 0x555   :  { %v3405_v5 = vand.u32 4294901760, %v5430_v2  ;;  %5133 = vmatprep.subr.bf16.mxu1 %v6269_v1  ;;  %v3494_v21 = vand.u32 4294901760, %v3493_v6  ;;  %v6272_v53 = vpack.c.bf16 %v3500_v52, %v3493_v6 }
 0x556   :  { %5135 = vmatpush3.bf16.msra.mxu1 %v6269_v1  ;;  %v3502_v54 = vsub.f32 %v3500_v52, %v3501_v60  ;;  %v3514_v0 = vsub.f32 %v5428_v27, %v3408_v10 }
 0x557   :  { %v5432_v12 = vpop.eup %5431  ;;  %v6276_v9 = vpack.c.bf16 %v3408_v10, %v3405_v5  ;;  %v3495_v34 = vsub.f32 %v3493_v6, %v3494_v21  ;;  %v3507_v13 = vsub.f32 %v5430_v2, %v3405_v5  ;;  %v6278_v18 = vpack.c.bf16 %v3501_v60, %v3494_v21 }
 0x558   :  { %v5434_v20 = vpop.eup %5433  ;;  %v3414_v22 = vand.u32 4294901760, %v5432_v12  ;;  %v3503_v11 = vand.u32 4294901760, %v3502_v54  ;;  %v3515_v25 = vand.u32 4294901760, %v3514_v0 }
 0x559   :  { %v3411_v40 = vand.u32 4294901760, %v5434_v20  ;;  %5137 = vmatprep.subr.bf16.mxu1 %v6276_v9  ;;  %v3496_v29 = vand.u32 4294901760, %v3495_v34  ;;  %v3508_v46 = vand.u32 4294901760, %v3507_v13  ;;  %v5168_v16 = vpack.c.bf16 %v3514_v0, %v3507_v13 }
 0x55a   :  { %5139 = vmatpush3.bf16.msra.mxu1 %v6276_v9  ;;  %v3516_v47 = vsub.f32 %v3514_v0, %v3515_v25  ;;  %v3528_v15 = vsub.f32 %v5432_v12, %v3414_v22 }
 0x55b   :  { %v5436_v55 = vpop.eup %5435  ;;  %v6285_v59 = vpack.c.bf16 %v3414_v22, %v3411_v40  ;;  %v5148_v56 = vpack.c.bf16 %v3503_v11, %v3496_v29  ;;  %v3509_v4 = vsub.f32 %v3507_v13, %v3508_v46  ;;  %v3521_v61 = vsub.f32 %v5434_v20, %v3411_v40 }
 0x55c   :  { %v5438_v35 = vpop.eup %5437  ;;  %v3420_v43 = vand.u32 4294901760, %v5436_v55  ;;  %v3517_v63 = vand.u32 4294901760, %v3516_v47  ;;  %v3529_v17 = vand.u32 4294901760, %v3528_v15  ;;  %v5200_v19 = vpack.c.bf16 %v3515_v25, %v3508_v46 }
 0x55d   :  { %v3417_v30 = vand.u32 4294901760, %v5438_v35  ;;  %5141 = vmatprep.subr.bf16.mxu1 %v6285_v59  ;;  %5149 = vmatprep.subr.bf16.mxu0 %v5148_v56  ;;  %v3510_v37 = vand.u32 4294901760, %v3509_v4  ;;  %v3522_v42 = vand.u32 4294901760, %v3521_v61  ;;  %v5172_v45 = vpack.c.bf16 %v3528_v15, %v3521_v61 }
 0x55e   :  { %5143 = vmatpush3.bf16.msra.mxu1 %v6285_v59  ;;  %5151 = vmatpush3.bf16.msra.mxu0 %v5148_v56  ;;  %v3530_v50 = vsub.f32 %v3528_v15, %v3529_v17  ;;  %v3542_v28 = vsub.f32 %v5436_v55, %v3420_v43 }
 0x55f   :  { %v6289_v3 = vpack.c.bf16 %v3420_v43, %v3417_v30  ;;  %v5152_v62 = vpack.c.bf16 %v3517_v63, %v3510_v37  ;;  %v3523_v26 = vsub.f32 %v3521_v61, %v3522_v42  ;;  %v3535_v8 = vsub.f32 %v5438_v35, %v3417_v30 }
 0x560   :  { %v3531_v36 = vand.u32 4294901760, %v3530_v50  ;;  %v3543_v14 = vand.u32 4294901760, %v3542_v28  ;;  %v5204_v32 = vpack.c.bf16 %v3529_v17, %v3522_v42 }
 0x561   :  { %5145 = vmatprep.subr.bf16.mxu1 %v6289_v3  ;;  %5153 = vmatprep.subr.bf16.mxu0 %v5152_v62  ;;  %v3524_v38 = vand.u32 4294901760, %v3523_v26  ;;  %v3536_v39 = vand.u32 4294901760, %v3535_v8  ;;  %v5176_v44 = vpack.c.bf16 %v3542_v28, %v3535_v8 }
 0x562   :  { %5147 = vmatpush3.bf16.msra.mxu1 %v6289_v3  ;;  %5155 = vmatpush3.bf16.msra.mxu0 %v5152_v62  ;;  %v3544_v48 = vsub.f32 %v3542_v28, %v3543_v14 }
 0x563   :  { %v5156_v49 = vpack.c.bf16 %v3531_v36, %v3524_v38  ;;  %v3537_v51 = vsub.f32 %v3535_v8, %v3536_v39  ;;  %v5208_v52 = vpack.c.bf16 %v3543_v14, %v3536_v39 }
 0x564   :  { %v3545_v27 = vand.u32 4294901760, %v3544_v48 }
 0x565   :  { %4795 = vmatmul.mubr.f32.vlgmr.msra.gmra.mrb[20].mxu1 %v3485_v33  ;;  %5157 = vmatprep.subr.bf16.mxu0 %v5156_v49  ;;  %v3538_v6 = vand.u32 4294901760, %v3537_v51 }
 0x566   :  { %5159 = vmatpush3.bf16.msra.mxu0 %v5156_v49 }
 0x567   :  { %v5160_v2 = vpack.c.bf16 %v3545_v27, %v3538_v6 }
 0x569   :  { %5161 = vmatprep.subr.bf16.mxu0 %v5160_v2 }
 0x56a   :  { %5163 = vmatpush3.bf16.msra.mxu0 %v5160_v2 }
 0x56b   :  { %5165 = vmatprep.subr.bf16.mxu0 %v6272_v53 }
 0x56d   :  { %4814 = vmatmul.mubr.f32.vlgmr.msra.gmra.mrb[12].mxu0 %v6264_v24 }
 0x56e   :  { %5167 = vmatpush3.bf16.msra.mxu0 %v6272_v53  ;;  %4832 = vmatprep.mubr.f32.mxu0 %v6257_v31 }
 0x56f   :  { %5169 = vmatprep.subr.bf16.mxu0 %v5168_v16 }
 0x572   :  { %5171 = vmatpush3.bf16.msra.mxu0 %v5168_v16 }
 0x573   :  { %5173 = vmatprep.subr.bf16.mxu0 %v5172_v45 }
 0x576   :  { %5175 = vmatpush3.bf16.msra.mxu0 %v5172_v45 }
 0x577   :  { %5177 = vmatprep.subr.bf16.mxu0 %v5176_v44 }
 0x57a   :  { %5179 = vmatpush3.bf16.msra.mxu0 %v5176_v44 }
 0x57b   :  { %5181 = vmatprep.subr.bf16.mxu0 %v6269_v1 }
 0x57d   :  { %4833 = vmatmul.mubr.f32.vlgmr.msra.gmra.mrb[12].mxu0 %v6267_v57  ;;  %v3389_v57 = vpop.permute.xlu1 %3388 }
 0x57e   :  { %5183 = vmatpush3.bf16.msra.mxu0 %v6269_v1  ;;  %4851 = vmatprep.mubr.f32.mxu0 %v3473_v41 }
 0x57f   :  { %5185 = vmatprep.subr.bf16.mxu0 %v6276_v9 }
 0x582   :  { %5187 = vmatpush3.bf16.msra.mxu0 %v6276_v9 }
 0x583   :  { %5189 = vmatprep.subr.bf16.mxu0 %v6285_v59 }
 0x586   :  { %5191 = vmatpush3.bf16.msra.mxu0 %v6285_v59 }
 0x587   :  { %5193 = vmatprep.subr.bf16.mxu0 %v6289_v3 }
 0x58a   :  { %5195 = vmatpush3.bf16.msra.mxu0 %v6289_v3 }
 0x58b   :  { %5197 = vmatprep.subr.bf16.mxu0 %v6278_v18 }
 0x58d   :  { %4852 = vmatmul.mubr.f32.vlgmr.msra.gmra.mrb[12].mxu0 %v3483_v7 }
 0x58e   :  { %5199 = vmatpush3.bf16.msra.mxu0 %v6278_v18  ;;  %4870 = vmatprep.mubr.f32.mxu0 %v6254_v23 }
 0x58f   :  { %5201 = vmatprep.subr.bf16.mxu0 %v5200_v19 }
 0x592   :  { %5203 = vmatpush3.bf16.msra.mxu0 %v5200_v19 }
 0x593   :  { %5205 = vmatprep.subr.bf16.mxu0 %v5204_v32 }
 0x596   :  { %5207 = vmatpush3.bf16.msra.mxu0 %v5204_v32 }
 0x597   :  { %5209 = vmatprep.subr.bf16.mxu0 %v5208_v52 }
 0x59a   :  { %5211 = vmatpush3.bf16.msra.mxu0 %v5208_v52 }
 0x59b   :  { %5213 = vmatprep.subr.bf16.mxu0 %v6269_v1 }
 0x59d   :  { %4871 = vmatmul.mubr.f32.vlgmr.msra.gmra.mrb[12].mxu0 %v6264_v24 }
 0x59e   :  { %5215 = vmatpush3.bf16.msra.mxu0 %v6269_v1  ;;  %4889 = vmatprep.mubr.f32.mxu0 %v6254_v23  ;;  %v3384_v1 = vpop.permute.xlu0 %3383 }
 0x59f   :  { %5217 = vmatprep.subr.bf16.mxu0 %v6276_v9 }
 0x5a2   :  { %5219 = vmatpush3.bf16.msra.mxu0 %v6276_v9 }
 0x5a3   :  { %5221 = vmatprep.subr.bf16.mxu0 %v6285_v59 }
 0x5a6   :  { %5223 = vmatpush3.bf16.msra.mxu0 %v6285_v59 }
 0x5a7   :  { %5225 = vmatprep.subr.bf16.mxu0 %v6289_v3 }
 0x5aa   :  { %5227 = vmatpush3.bf16.msra.mxu0 %v6289_v3 }
 0x5ad   :  { %4890 = vmatmul.mubr.f32.vlgmr.msra.gmra.mrb[12].mxu0 %v6264_v24 }
 0x638   :  { %v4796_v31 = vpop.f32.mrb[20].mxu1 }
 0x639   :  { %v3477_v41 = vpop.f32.mrb[21].mxu1  ;;  %v3488_v10 = vadd.f32 %v4796_v31, %v3389_v57 }
 0x63a   :  { %v3478_v23 = vadd.f32 %v3477_v41, %v3384_v1 }
 0x680   :  { %v4891_v60 = vpop.f32.mrb[12].mxu0 }
 0x681   :  { %v5261_v5 = vadd.f32 %v4891_v60, %v3488_v10  ;;  %v3968_v21 = vpop.f32.mrb[13].mxu0 }
 0x682   :  { %v5263_v53 = vadd.f32 %v3968_v21, %v3478_v23 }
 0x683   :  { %v3997_v54 = vmul.f32 -1.442695, %v5261_v5 }
 0x684   :  { %v3996_v0 = vmul.f32 -1.442695, %v5263_v53 }
 0x685   :  { %5439 = vpow2.f32 %v3997_v54 }
 0x686   :  { %5441 = vpow2.f32 %v3996_v0 }
 0x68f   :  { %v5440_v7 = vpop.eup %5439 }
 0x690   :  { %v5442_v12 = vpop.eup %5441  ;;  %v3985_v9 = vadd.f32 1.0, %v5440_v7 }
 0x691   :  { %v3984_v34 = vadd.f32 1.0, %v5442_v12 }
 0x692   :  { %5443 = vrcp.f32 %v3985_v9 }
 0x693   :  { %5445 = vrcp.f32 %v3984_v34 }
 0x69c   :  { %v5444_v24 = vpop.eup %5443 }
 0x69d   :  { %v5446_v13 = vpop.eup %5445  ;;  %3991 = vst.msk [vmem:[%s6339_s7 + $0x8] sm:$0xff] %vm715_vm2, %v5444_v24 }
 0x69e   :  { %3990 = vst.msk [vmem:[%s6339_s7] sm:$0xff] %vm715_vm2, %v5446_v13 }

</bundles_post_ra>
